<compile_context>
chip_gen: v7x
topology: tpu7x:2x2x1
jax: 0.10.0
libtpu: 0.0.40
codegen_flags: <defaults>
</compile_context>

<pallas_src>
import functools
import math

import jax
import jax.numpy as jnp
from jax import lax
from jax.experimental import pallas as pl
from jax.experimental.pallas import tpu as pltpu


# --------------------------------------------------------------------------- kernel
def _lk_conv_kernel(xpk_ref, w_ref, b_ref, o_ref, *, K, stride, th, wo, kc, cout):
    """One (batch, row-tile) step of the folded KxK conv + bias.

    xpk_ref : (Hp, Wo, K*Cin)   zero-padded input with the K kw-taps (and W-stride)
                                pre-packed onto the lane axis (bf16); image-resident
    w_ref   : (K, K*Cin, Cout)  folded weights, one (K*Cin, Cout) slab per kh (bf16)
    b_ref   : (1, Cout)         folded per-channel bias (f32)
    o_ref   : (Cout, th*Wo)     NCHW-flat output tile (bf16, lane-dense on th*Wo)
    """
    t = pl.program_id(1)
    row0 = pl.multiple_of(t * (th * stride), th * stride)
    m = th * wo

    # Bias folded into the accumulator init (saves a separate epilogue VPU pass).
    acc = jnp.broadcast_to(b_ref[...], (m, cout)).astype(jnp.float32)

    # One MXU contraction of width K*Cin per kernel row: K dots instead of K*K,
    # and no kw-offset (non-8-aligned sublane) slices inside the kernel.
    for kh in range(K):
        if stride == 1:
            lhs = xpk_ref[pl.ds(row0 + kh, th), :, :]            # (th, Wo, K*Cin)
        else:
            # TODO(synk): stride>1 path (strided leading-dim slice) is untested.
            lhs = xpk_ref[pl.ds(row0 + kh, th, stride), :, :]
        acc = acc + jnp.dot(lhs.reshape(m, kc), w_ref[kh],
                            preferred_element_type=jnp.float32)

    # Emit NCHW directly: on-chip transpose of the accumulator instead of a separate
    # lane-hostile HBM transpose pass after the kernel.
    o_ref[...] = jnp.transpose(acc).astype(o_ref.dtype)


# ---------------------------------------------------------------- trace-time folding
def _fold_tower(tower):
    """RepTowerBlock (three 1x1 convs -> BN, + identity skip)  ==>  y @ A + b."""
    T = tower['t1'] @ tower['t2'] @ tower['t3']                      # (C, C)
    A = T * tower['bn_scale'][None, :] + jnp.eye(T.shape[0], dtype=T.dtype)
    return A, tower['bn_bias']


def _fold_branch(w_hwio, bn_scale, bn_bias, tower):
    """(Conv -> BN -> RepTower(+skip))  ==>  single conv weight (HWIO) + channel bias."""
    A, b_t = _fold_tower(tower)
    M = bn_scale[:, None] * A                                        # diag(bn_scale) @ A
    w_f = jnp.einsum('hwio,op->hwip', w_hwio, M)
    b_f = bn_bias @ A + b_t
    return w_f, b_f


def _inflate_to_K(w_hwio, dilation, K):
    """Embed a k x k kernel with dilation r into a dense, centered K x K kernel."""
    k = w_hwio.shape[0]
    eff = dilation * (k - 1) + 1
    cin, cout = w_hwio.shape[2], w_hwio.shape[3]
    w_eff = jnp.zeros((eff, eff, cin, cout), w_hwio.dtype)
    w_eff = w_eff.at[::dilation, ::dilation].set(w_hwio)
    off = (K - eff) // 2
    w_big = jnp.zeros((K, K, cin, cout), w_hwio.dtype)
    return w_big.at[off:off + eff, off:off + eff].set(w_eff)


def fold_rep_bn(params, *, kernel_size, kernel_sizes, dilates):
    """Fold the whole Rep_bn block (all branches) into one KxK conv weight + bias."""
    K = kernel_size
    o = params['origin']
    w_total, b_total = _fold_branch(o['w'], o['bn_scale'], o['bn_bias'], o['tower'])
    for (k, r), br in zip(zip(kernel_sizes, dilates), params['branches']):
        w_f, b_f = _fold_branch(br['w'], br['bn_scale'], br['bn_bias'], br['tower'])
        w_total = w_total + _inflate_to_K(w_f, r, K)
        b_total = b_total + b_f
    inv = 1.0 / math.sqrt(len(kernel_sizes))                         # matches the module
    return w_total * inv, b_total * inv


# -------------------------------------------------------------------------- wrapper
def _pick_row_tile(Ho, Wo, max_rows=2048):
    """Largest divisor th of Ho with th*Wo <= max_rows and a lane-legal output block."""
    th = Ho
    for cand in range(Ho, 0, -1):
        if Ho % cand:
            continue
        if cand * Wo > max_rows:
            continue
        if cand != Ho and (cand * Wo) % 128:
            continue
        th = cand
        break
    return th


def rep_bn_forward(x_nchw, params, *, kernel_size, stride, kernel_sizes, dilates):
    K = kernel_size
    pad = K // 2
    w, b = fold_rep_bn(params, kernel_size=K, kernel_sizes=kernel_sizes, dilates=dilates)

    N, Cin, H, W = x_nchw.shape
    Cout = w.shape[-1]
    Hp = H + 2 * pad
    Ho = (H + 2 * pad - K) // stride + 1
    Wo = (W + 2 * pad - K) // stride + 1
    KC = K * Cin

    # Single fused prep chain: NCHW->NHWC, zero pad, pack the K kw-taps (and the
    # W-stride) onto the channel/lane axis, cast to bf16.  The kernel then reads
    # lane-dense (K*Cin wide) im2col-W slabs straight from the ref.
    x = jnp.transpose(x_nchw, (0, 2, 3, 1))
    xp = jnp.pad(x, ((0, 0), (pad, pad), (pad, pad), (0, 0)))
    cols = [xp[:, :, kw: kw + (Wo - 1) * stride + 1: stride, :] for kw in range(K)]
    xpk = jnp.concatenate(cols, axis=-1).astype(jnp.bfloat16)        # (N, Hp, Wo, K*Cin)

    w_flat = w.reshape(K, KC, Cout).astype(jnp.bfloat16)             # bf16 MXU fast path
    b_row = b.reshape(1, Cout).astype(jnp.float32)                   # epilogue stays f32

    th = _pick_row_tile(Ho, Wo)                                      # th = Ho here (M=256)
    grid = (N, Ho // th)

    out_flat = pl.pallas_call(
        functools.partial(_lk_conv_kernel, K=K, stride=stride,
                          th=th, wo=Wo, kc=KC, cout=Cout),
        out_shape=jax.ShapeDtypeStruct((N, Cout, Ho * Wo), jnp.bfloat16),
        grid=grid,
        in_specs=[
            # packed image: block index constant across the row-tile axis (resident)
            pl.BlockSpec((None, Hp, Wo, KC), lambda n, t: (n, 0, 0, 0)),
            # folded weights / bias are grid-invariant (VMEM-resident across steps)
            pl.BlockSpec((K, KC, Cout), lambda n, t: (0, 0, 0)),
            pl.BlockSpec((1, Cout), lambda n, t: (0, 0)),
        ],
        out_specs=pl.BlockSpec((None, Cout, th * Wo), lambda n, t: (n, 0, t)),
        compiler_params=pltpu.CompilerParams(
            dimension_semantics=("parallel", "arbitrary"),
            vmem_limit_bytes=32 * 1024 * 1024),
    )(xpk, w_flat, b_row)

    return out_flat.reshape(N, Cout, Ho, Wo)                         # metadata-only split


# --------------------------------------------------------------- params & reference
def init_params(key, cin, cout, kernel_size, kernel_sizes, dilates):
    keys = iter(jax.random.split(key, 64))

    def conv_w(k_, ci, co):                                          # HWIO
        fan_in = k_ * k_ * ci
        return jax.random.normal(next(keys), (k_, k_, ci, co), jnp.float32) / math.sqrt(fan_in)

    def bn(c):                                                       # inference-mode affine
        scale = jax.random.uniform(next(keys), (c,), minval=0.5, maxval=1.5)
        bias = jax.random.normal(next(keys), (c,)) * 0.1
        return scale, bias

    def tower(c):                                                    # RepTowerBlock, expand=4
        hid = 4 * c
        t1 = jax.random.normal(next(keys), (c, hid), jnp.float32) / math.sqrt(c)
        t2 = jax.random.normal(next(keys), (hid, hid), jnp.float32) / math.sqrt(hid)
        t3 = jax.random.normal(next(keys), (hid, c), jnp.float32) / math.sqrt(hid)
        s, b2 = bn(c)
        return dict(t1=t1, t2=t2, t3=t3, bn_scale=s, bn_bias=b2)

    s0, b0 = bn(cout)
    origin = dict(w=conv_w(kernel_size, cin, cout), bn_scale=s0, bn_bias=b0,
                  tower=tower(cout))
    branches = []
    for k_, r in zip(kernel_sizes, dilates):
        s, b = bn(cout)
        branches.append(dict(w=conv_w(k_, cin, cout), bn_scale=s, bn_bias=b,
                             tower=tower(cout)))
    return dict(origin=origin, branches=branches)


def reference(x_nchw, params, *, kernel_size, stride, kernel_sizes, dilates):
    """Unfused plain-JAX forward matching the PyTorch module (inference-mode BN)."""
    K = kernel_size
    x = jnp.transpose(x_nchw, (0, 2, 3, 1)).astype(jnp.float32)

    def conv(inp, w, pad, dil):
        return lax.conv_general_dilated(
            inp, w, (stride, stride), ((pad, pad), (pad, pad)),
            rhs_dilation=(dil, dil), dimension_numbers=('NHWC', 'HWIO', 'NHWC'))

    def tower_apply(y, tw):
        h = jnp.einsum('nhwc,cd->nhwd', y, tw['t1'])
        h = jnp.einsum('nhwc,cd->nhwd', h, tw['t2'])
        h = jnp.einsum('nhwc,cd->nhwd', h, tw['t3'])
        h = h * tw['bn_scale'] + tw['bn_bias']
        return h + y                                                  # identity skip

    o = params['origin']
    y = conv(x, o['w'], K // 2, 1) * o['bn_scale'] + o['bn_bias']
    out = tower_apply(y, o['tower'])
    for (k, r), br in zip(zip(kernel_sizes, dilates), params['branches']):
        pad = (r * (k - 1) + 1) // 2
        y = conv(x, br['w'], pad, r) * br['bn_scale'] + br['bn_bias']
        out = out + tower_apply(y, br['tower'])
    out = out / math.sqrt(len(kernel_sizes))
    return jnp.transpose(out, (0, 3, 1, 2))


# ----------------------------------------------------------------------------- main
if __name__ == "__main__":
    key = jax.random.PRNGKey(0)
    kx, kp = jax.random.split(key)

    # Rep_bn(inchannels=64, outchannels=128, kernel_size=5, stride=1, bias=False, group=1)
    N, Cin, Cout, H, W = 2, 64, 128, 16, 16
    kernel_size, stride = 5, 1
    kernel_sizes, dilates = [3, 3], [1, 2]                            # the K==5 config

    x = jax.random.normal(kx, (N, Cin, H, W), jnp.float32)
    params = init_params(kp, Cin, Cout, kernel_size, kernel_sizes, dilates)

    fwd = jax.jit(functools.partial(
        rep_bn_forward, kernel_size=kernel_size, stride=stride,
        kernel_sizes=tuple(kernel_sizes), dilates=tuple(dilates)))
    out = jax.block_until_ready(fwd(x, params))

    ref = reference(x, params, kernel_size=kernel_size, stride=stride,
                    kernel_sizes=kernel_sizes, dilates=dilates)
    assert out.shape == (N, Cout, H, W), out.shape
    err = float(jnp.max(jnp.abs(out.astype(jnp.float32) - ref)))
    scale = float(jnp.max(jnp.abs(ref)))
    # bf16 inputs/weights/output with f32 accumulation -> scale-aware tolerance.
    assert err <= 5e-2 + 5e-2 * scale, (err, scale)
    print("KERNEL_OK")
</pallas_src>

<mosaic_0001>
module attributes {stable_mosaic.version = 11 : i64} {
  func.func @_lk_conv_kernel(%arg0: i32, %arg1: i32, %arg2: memref<1x20x16x320xbf16, #tpu.memory_space<vmem>>, %arg3: memref<5x320x128xbf16, #tpu.memory_space<vmem>>, %arg4: memref<1x128xf32, #tpu.memory_space<vmem>>, %arg5: memref<1x128x256xbf16, #tpu.memory_space<vmem>>) attributes {dimension_semantics = [#tpu.dimension_semantics<parallel>, #tpu.dimension_semantics<arbitrary>], iteration_bounds = array<i64: 2, 1>, scalar_prefetch = 0 : i64, scratch_operands = 0 : i64, tpu.core_type = #tpu.core_type<tc>, window_params = [{transform_indices = @transform_0, window_bounds = array<i64: 1, 20, 16, 320>}, {pipeline_mode = #tpu.pipeline_mode<synchronous>, transform_indices = @transform_1, window_bounds = array<i64: 5, 320, 128>}, {pipeline_mode = #tpu.pipeline_mode<synchronous>, transform_indices = @transform_2, window_bounds = array<i64: 1, 128>}, {transform_indices = @transform_3, window_bounds = array<i64: 1, 128, 256>}]} {
    %c16_i32 = arith.constant 16 : i32
    %0 = arith.muli %arg1, %c16_i32 : i32
    %1 = tpu.assume_multiple %0, 16 : i32
    %c0 = arith.constant 0 : index
    %c0_0 = arith.constant 0 : index
    %2 = vector.load %arg4[%c0, %c0_0] : memref<1x128xf32, #tpu.memory_space<vmem>>, vector<1x128xf32>
    %3 = vector.shape_cast %2 : vector<1x128xf32> to vector<1x128xf32>
    %4 = vector.broadcast %3 : vector<1x128xf32> to vector<256x128xf32>
    %c0_i32 = arith.constant 0 : i32
    %5 = arith.addi %1, %c0_i32 : i32
    %c0_1 = arith.constant 0 : index
    %6 = arith.index_cast %5 : i32 to index
    %c0_2 = arith.constant 0 : index
    %c0_3 = arith.constant 0 : index
    %7 = vector.load %arg2[%c0_1, %6, %c0_2, %c0_3] : memref<1x20x16x320xbf16, #tpu.memory_space<vmem>>, vector<1x16x16x320xbf16>
    %8 = vector.shape_cast %7 : vector<1x16x16x320xbf16> to vector<16x16x320xbf16>
    %9 = vector.shape_cast %8 : vector<16x16x320xbf16> to vector<256x320xbf16>
    %c0_4 = arith.constant 0 : index
    %c0_5 = arith.constant 0 : index
    %c0_6 = arith.constant 0 : index
    %10 = vector.load %arg3[%c0_4, %c0_5, %c0_6] : memref<5x320x128xbf16, #tpu.memory_space<vmem>>, vector<1x320x128xbf16>
    %11 = vector.shape_cast %10 : vector<1x320x128xbf16> to vector<320x128xbf16>
    %cst = arith.constant dense<0.000000e+00> : vector<256x128xf32>
    %12 = tpu.matmul %9, %11, %cst {dimension_numbers = #tpu.dot_dimension_numbers<[1], [0], [0], [1], [0, 0, 1, 1], [], []>} : vector<256x320xbf16>, vector<320x128xbf16>, vector<256x128xf32> -> vector<256x128xf32>
    %13 = arith.addf %4, %12 : vector<256x128xf32>
    %c1_i32 = arith.constant 1 : i32
    %14 = arith.addi %1, %c1_i32 : i32
    %c0_7 = arith.constant 0 : index
    %15 = arith.index_cast %14 : i32 to index
    %c0_8 = arith.constant 0 : index
    %c0_9 = arith.constant 0 : index
    %16 = vector.load %arg2[%c0_7, %15, %c0_8, %c0_9] : memref<1x20x16x320xbf16, #tpu.memory_space<vmem>>, vector<1x16x16x320xbf16>
    %17 = vector.shape_cast %16 : vector<1x16x16x320xbf16> to vector<16x16x320xbf16>
    %18 = vector.shape_cast %17 : vector<16x16x320xbf16> to vector<256x320xbf16>
    %c1 = arith.constant 1 : index
    %c0_10 = arith.constant 0 : index
    %c0_11 = arith.constant 0 : index
    %19 = vector.load %arg3[%c1, %c0_10, %c0_11] : memref<5x320x128xbf16, #tpu.memory_space<vmem>>, vector<1x320x128xbf16>
    %20 = vector.shape_cast %19 : vector<1x320x128xbf16> to vector<320x128xbf16>
    %cst_12 = arith.constant dense<0.000000e+00> : vector<256x128xf32>
    %21 = tpu.matmul %18, %20, %cst_12 {dimension_numbers = #tpu.dot_dimension_numbers<[1], [0], [0], [1], [0, 0, 1, 1], [], []>} : vector<256x320xbf16>, vector<320x128xbf16>, vector<256x128xf32> -> vector<256x128xf32>
    %22 = arith.addf %13, %21 : vector<256x128xf32>
    %c2_i32 = arith.constant 2 : i32
    %23 = arith.addi %1, %c2_i32 : i32
    %c0_13 = arith.constant 0 : index
    %24 = arith.index_cast %23 : i32 to index
    %c0_14 = arith.constant 0 : index
    %c0_15 = arith.constant 0 : index
    %25 = vector.load %arg2[%c0_13, %24, %c0_14, %c0_15] : memref<1x20x16x320xbf16, #tpu.memory_space<vmem>>, vector<1x16x16x320xbf16>
    %26 = vector.shape_cast %25 : vector<1x16x16x320xbf16> to vector<16x16x320xbf16>
    %27 = vector.shape_cast %26 : vector<16x16x320xbf16> to vector<256x320xbf16>
    %c2 = arith.constant 2 : index
    %c0_16 = arith.constant 0 : index
    %c0_17 = arith.constant 0 : index
    %28 = vector.load %arg3[%c2, %c0_16, %c0_17] : memref<5x320x128xbf16, #tpu.memory_space<vmem>>, vector<1x320x128xbf16>
    %29 = vector.shape_cast %28 : vector<1x320x128xbf16> to vector<320x128xbf16>
    %cst_18 = arith.constant dense<0.000000e+00> : vector<256x128xf32>
    %30 = tpu.matmul %27, %29, %cst_18 {dimension_numbers = #tpu.dot_dimension_numbers<[1], [0], [0], [1], [0, 0, 1, 1], [], []>} : vector<256x320xbf16>, vector<320x128xbf16>, vector<256x128xf32> -> vector<256x128xf32>
    %31 = arith.addf %22, %30 : vector<256x128xf32>
    %c3_i32 = arith.constant 3 : i32
    %32 = arith.addi %1, %c3_i32 : i32
    %c0_19 = arith.constant 0 : index
    %33 = arith.index_cast %32 : i32 to index
    %c0_20 = arith.constant 0 : index
    %c0_21 = arith.constant 0 : index
    %34 = vector.load %arg2[%c0_19, %33, %c0_20, %c0_21] : memref<1x20x16x320xbf16, #tpu.memory_space<vmem>>, vector<1x16x16x320xbf16>
    %35 = vector.shape_cast %34 : vector<1x16x16x320xbf16> to vector<16x16x320xbf16>
    %36 = vector.shape_cast %35 : vector<16x16x320xbf16> to vector<256x320xbf16>
    %c3 = arith.constant 3 : index
    %c0_22 = arith.constant 0 : index
    %c0_23 = arith.constant 0 : index
    %37 = vector.load %arg3[%c3, %c0_22, %c0_23] : memref<5x320x128xbf16, #tpu.memory_space<vmem>>, vector<1x320x128xbf16>
    %38 = vector.shape_cast %37 : vector<1x320x128xbf16> to vector<320x128xbf16>
    %cst_24 = arith.constant dense<0.000000e+00> : vector<256x128xf32>
    %39 = tpu.matmul %36, %38, %cst_24 {dimension_numbers = #tpu.dot_dimension_numbers<[1], [0], [0], [1], [0, 0, 1, 1], [], []>} : vector<256x320xbf16>, vector<320x128xbf16>, vector<256x128xf32> -> vector<256x128xf32>
    %40 = arith.addf %31, %39 : vector<256x128xf32>
    %c4_i32 = arith.constant 4 : i32
    %41 = arith.addi %1, %c4_i32 : i32
    %c0_25 = arith.constant 0 : index
    %42 = arith.index_cast %41 : i32 to index
    %c0_26 = arith.constant 0 : index
    %c0_27 = arith.constant 0 : index
    %43 = vector.load %arg2[%c0_25, %42, %c0_26, %c0_27] : memref<1x20x16x320xbf16, #tpu.memory_space<vmem>>, vector<1x16x16x320xbf16>
    %44 = vector.shape_cast %43 : vector<1x16x16x320xbf16> to vector<16x16x320xbf16>
    %45 = vector.shape_cast %44 : vector<16x16x320xbf16> to vector<256x320xbf16>
    %c4 = arith.constant 4 : index
    %c0_28 = arith.constant 0 : index
    %c0_29 = arith.constant 0 : index
    %46 = vector.load %arg3[%c4, %c0_28, %c0_29] : memref<5x320x128xbf16, #tpu.memory_space<vmem>>, vector<1x320x128xbf16>
    %47 = vector.shape_cast %46 : vector<1x320x128xbf16> to vector<320x128xbf16>
    %cst_30 = arith.constant dense<0.000000e+00> : vector<256x128xf32>
    %48 = tpu.matmul %45, %47, %cst_30 {dimension_numbers = #tpu.dot_dimension_numbers<[1], [0], [0], [1], [0, 0, 1, 1], [], []>} : vector<256x320xbf16>, vector<320x128xbf16>, vector<256x128xf32> -> vector<256x128xf32>
    %49 = arith.addf %40, %48 : vector<256x128xf32>
    %50 = tpu.transpose %49, [1, 0] : vector<256x128xf32> -> vector<128x256xf32>
    %51 = arith.truncf %50 : vector<128x256xf32> to vector<128x256xbf16>
    %c0_31 = arith.constant 0 : index
    %c0_32 = arith.constant 0 : index
    %c0_33 = arith.constant 0 : index
    %52 = vector.load %arg5[%c0_31, %c0_32, %c0_33] : memref<1x128x256xbf16, #tpu.memory_space<vmem>>, vector<1x128x256xbf16>
    %53 = vector.shape_cast %52 : vector<1x128x256xbf16> to vector<128x256xbf16>
    %54 = vector.shape_cast %51 : vector<128x256xbf16> to vector<1x128x256xbf16>
    tpu.vector_store %arg5[%c0_31, %c0_32, %c0_33], %54 {strides = array<i32>} : memref<1x128x256xbf16, #tpu.memory_space<vmem>>, vector<1x128x256xbf16>,
    return
  }
  func.func @transform_0(%arg0: i32, %arg1: i32) -> (i32, i32, i32, i32) {
    %c0_i32 = arith.constant 0 : i32
    %c0_i32_0 = arith.constant 0 : i32
    %c0_i32_1 = arith.constant 0 : i32
    %c0_i32_2 = arith.constant 0 : i32
    return %arg0, %c0_i32, %c0_i32_0, %c0_i32_1 : i32, i32, i32, i32
  }
  func.func @transform_1(%arg0: i32, %arg1: i32) -> (i32, i32, i32) {
    %c0_i32 = arith.constant 0 : i32
    %c0_i32_0 = arith.constant 0 : i32
    %c0_i32_1 = arith.constant 0 : i32
    %c0_i32_2 = arith.constant 0 : i32
    return %c0_i32, %c0_i32_0, %c0_i32_1 : i32, i32, i32
  }
  func.func @transform_2(%arg0: i32, %arg1: i32) -> (i32, i32) {
    %c0_i32 = arith.constant 0 : i32
    %c0_i32_0 = arith.constant 0 : i32
    %c0_i32_1 = arith.constant 0 : i32
    return %c0_i32, %c0_i32_0 : i32, i32
  }
  func.func @transform_3(%arg0: i32, %arg1: i32) -> (i32, i32, i32) {
    %c0_i32 = arith.constant 0 : i32
    %c0_i32_0 = arith.constant 0 : i32
    return %arg0, %c0_i32, %arg1 : i32, i32, i32
  }
}

</mosaic_0001>

<bundles_post_ra>
// kernel: rep_bn_forward.1
= control target key start
LH: loop header
LB: loop body
LE: loop exit
PB: predicated region body
PF: predicated region fallthrough
CT: control target
= control target key end

     0   :  { %s7377_s12 = smov 0   ;;  %s7379_s13 = smov 0   ;;  %s8748_s0 = inlined_call_operand.vmem [shape: bf16[2,20,16,320], index: 0, kind: input, shape index: {}]   ;;  %s8749_s1 = inlined_call_operand.vmem [shape: bf16[5,320,128], index: 1, kind: input, shape index: {}]   ;;  %s8750_s2 = inlined_call_operand.vmem [shape: f32[1,128], index: 2, kind: input, shape index: {}]   ;;  %s8751_s3 = inlined_call_operand.vmem [shape: bf16[2,128,256], index: 3, kind: output, shape index: {}]  }
   0x1   :  { %s7381_s14 = smov 0  }
   0x2 LB: > { %s25_s15 = sadd.s32 1, %s7351_s13  ;;  %p4836_p0 = scmp.ge.s32.totalorder %s7355_s14, 1  ;;  %s7355_s14 = sphi %s7381_s14, %s13_s14   ;;  %s7351_s13 = sphi %s7379_s13, %s8781_s13   ;;  %s7347_s12 = sphi %s7377_s12, %s8780_s12  }
   0x3   : > { %p27_p1 = scmp.ge.s32.totalorder %s25_s15, 2  ;;  %p151_p2 = scmp.lt.s32.totalorder %s7355_s14, 3 }
   0x5   : > { %s8783_s15 = smov (%p27_p1, %s25_s15), 0  ;;  %p152_p3 = pnand %p4836_p0, %p151_p2 }
   0x7   : > { %155 = sbr.rel (%p152_p3) target bundleno = 899 (0x383), region = 32 }
   0xe   : > { %v7045_v0 = vld [vmem:[%s8749_s1 + $0x40] sm:$0xff]   ;;  %p179_p4 = scmp.lt.s32.totalorder %s7347_s12, 1  ;;  %v7048_v3 = vld [vmem:[%s8749_s1 + $0x48] sm:$0xff]   ;;  %v7051_v6 = vld [vmem:[%s8749_s1 + $0x50] sm:$0xff]   ;;  %vm670_vm0 = vcmask 523264  }
   0xf   : > { %v7046_v1 = vld [vmem:[%s8749_s1 + $0x80] sm:$0xff]   ;;  %5712 = vmatprep.subr.bf16.mxu0 %v7045_v0  ;;  %v7049_v4 = vld [vmem:[%s8749_s1 + $0x88] sm:$0xff]   ;;  %v7052_v7 = vld [vmem:[%s8749_s1 + $0x90] sm:$0xff]  }
  0x10   : > { %v7047_v2 = vld [vmem:[%s8749_s1] sm:$0xff]   ;;  %s8785_s12 = smov (!%p179_p4, %s7347_s12), 1  ;;  %6372 = vmatprep.subr.bf16.mxu1 %v7046_v1  ;;  %v7050_v5 = vld [vmem:[%s8749_s1 + $0x8] sm:$0xff]   ;;  %v7053_v8 = vld [vmem:[%s8749_s1 + $0x10] sm:$0xff]  }
  0x11   : > { %5713 = vmatpush3.bf16.msra.mxu0 %v7047_v2  ;;  %6373 = vmatpush3.bf16.msra.mxu1 %v7046_v1  ;;  %s6908_s28 = smul.u32 480, %s8785_s12  ;;  %v7054_v9 = vld [vmem:[%s8749_s1 + $0x58] sm:$0xff]   ;;  %v7058_v13 = vld [vmem:[%s8749_s1 + $0x60] sm:$0xff]   ;;  %v7063_v18 = vld [vmem:[%s8749_s1 + $0x68] sm:$0xff]  }
  0x12   : > { %5714 = vmatprep.subr.bf16.mxu0 %v7048_v3  ;;  %6374 = vmatprep.subr.bf16.mxu1 %v7049_v4  ;;  %v7055_v10 = vld [vmem:[%s8749_s1 + $0x98] sm:$0xff]   ;;  %v7060_v15 = vld [vmem:[%s8749_s1 + $0xe0] sm:$0xff]   ;;  %v7064_v19 = vld [vmem:[%s8749_s1 + $0x28] sm:$0xff]  }
  0x13   : > { %s7431_s16 = scalar_lea.vmem %s8748_s0, %s6908_s28  ;;  %v7056_v11 = vld [vmem:[%s8749_s1 + $0x18] sm:$0xff]   ;;  %v7061_v16 = vld [vmem:[%s8749_s1 + $0x20] sm:$0xff]   ;;  %v7066_v21 = vld [vmem:[%s8749_s1 + $0x70] sm:$0xff]  }
  0x14   : > { %v7057_v12 = vld [vmem:[%s7431_s16 + $0x8] ss:$12 sps:$4 sm:$0xff]   ;;  %v7059_v14 = vld [vmem:[%s7431_s16 + $0x20] ss:$12 sps:$4 sm:$0xff]   ;;  %v7065_v20 = vld [vmem:[%s7431_s16 + $0x38] ss:$12 sps:$4 sm:$0xff]  }
  0x15   : > { %5715 = vmatpush3.bf16.msra.mxu0 %v7050_v5  ;;  %6375 = vmatpush3.bf16.msra.mxu1 %v7049_v4  ;;  %v7062_v17 = vld [vmem:[%s8749_s1 + $0xa0] sm:$0xff]   ;;  %v7067_v22 = vld [vmem:[%s7431_s16 + $0x50] ss:$12 sps:$4 sm:$0xff]   ;;  %v7068_v23 = vld [vmem:[%s8749_s1 + $0xe8] sm:$0xff]  }
  0x16   : > { %5716 = vmatprep.subr.bf16.mxu0 %v7051_v6  ;;  %6376 = vmatprep.subr.bf16.mxu1 %v7052_v7  ;;  %v7069_v24 = vld [vmem:[%s8749_s1 + $0x30] sm:$0xff]   ;;  %v7070_v25 = vld [vmem:[%s8749_s1 + $0xa8] sm:$0xff]   ;;  %v7071_v26 = vld [vmem:[%s8749_s1 + $0x78] sm:$0xff]  }
  0x17   : > { %6380 = vmatprep.mubr.msk.bf16.mxu1 %vm670_vm0, %v7057_v12  ;;  %v7072_v27 = vld [vmem:[%s8749_s1 + $0x38] sm:$0xff]   ;;  %v7073_v28 = vld [vmem:[%s7431_s16] ss:$12 sps:$4 sm:$0xff]   ;;  %v7075_v29 = vld [vmem:[%s7431_s16 + $0x4] ss:$12 sps:$4 sm:$0xff]  }
  0x18   : > { %v7076_v30 = vld [vmem:[%s7431_s16 + $0x68] ss:$12 sps:$4 sm:$0xff]   ;;  %751 = vmatprep.mubr.bf16.mxu0 %v7075_v29  ;;  %v7077_v31 = vld [vmem:[%s7431_s16 + $0x80] ss:$12 sps:$4 sm:$0xff]   ;;  %v7082_v35 = vld [vmem:[%s7431_s16 + $0x98] ss:$12 sps:$4 sm:$0xff]  }
  0x19   : > { %5717 = vmatpush3.bf16.msra.mxu0 %v7053_v8  ;;  %6377 = vmatpush3.bf16.msra.mxu1 %v7052_v7  ;;  %v7078_v32 = vld [vmem:[%s8749_s1 + $0xf0] sm:$0xff]   ;;  %v7495_v34 = vld [vmem:[%s7431_s16 + $0x1c] ss:$12 sps:$4 sm:$0xff]   ;;  %v7502_v36 = vld [vmem:[%s7431_s16 + $0x18] ss:$12 sps:$4 sm:$0xff]  }
  0x1a   : > { %5718 = vmatprep.subr.bf16.mxu0 %v7054_v9  ;;  %6378 = vmatprep.subr.bf16.mxu1 %v7055_v10  ;;  %v7079_v33 = vld [vmem:[%s8749_s1 + $0xb0] sm:$0xff]   ;;  %v7085_v38 = vld [vmem:[%s8749_s1 + $0xf8] sm:$0xff]   ;;  %v7091_v44 = vld [vmem:[%s8749_s1 + $0x100] sm:$0xff]  }
  0x1b   : > { %v7084_v37 = vld [vmem:[%s7431_s16 + $0xb0] ss:$12 sps:$4 sm:$0xff]   ;;  %v7088_v43 = vld [vmem:[%s7431_s16 + $0xc8] ss:$12 sps:$4 sm:$0xff]   ;;  %v7092_v45 = vld [vmem:[%s8749_s1 + $0xc0] sm:$0xff]  }
  0x1c   : > { %v7086_v39 = vld [vmem:[%s8749_s1 + $0xb8] sm:$0xff]   ;;  %v214_v40 = vld [vmem:[%s7431_s16 + $0x30] sm:$0xff]  ;;  %v7090_v46 = vld [vmem:[%s7431_s16 + $0xe0] ss:$12 sps:$4 sm:$0xff]  }
  0x1d   : > { %5719 = vmatpush3.bf16.msra.mxu0 %v7056_v11  ;;  %6379 = vmatpush3.bf16.msra.mxu1 %v7055_v10  ;;  %v216_v41 = vld [vmem:[%s7431_s16 + $0x3c] sm:$0xff]  ;;  %v7528_v47 = vld [vmem:[%s7431_s16 + $0x4c] ss:$12 sps:$4 sm:$0xff]   ;;  %v7105_v52 = vld [vmem:[%s8749_s1 + $0x110] sm:$0xff]  }
  0x1e   : > { %5720 = vmatprep.subr.bf16.mxu0 %v7058_v13  ;;  %6572 = vmatprep.subr.bf16.mxu1 %v7060_v15  ;;  %v7513_v42 = vcombine.high %v214_v40, %v216_v41  ;;  %v7095_v48 = vld [vmem:[%s7431_s16 + $0xf8] ss:$12 sps:$4 sm:$0xff]   ;;  %v7531_v49 = vcombine.low %v214_v40, %v216_v41  ;;  %v7098_v50 = vld [vmem:[%s8749_s1 + $0x108] sm:$0xff]   ;;  %v7106_v54 = vld [vmem:[%s8749_s1 + $0xd0] sm:$0xff]  }
  0x1f   : > { %v7099_v51 = vld [vmem:[%s8749_s1 + $0xc8] sm:$0xff]   ;;  %v7097_v55 = vld [vmem:[%s7431_s16 + $0x110] ss:$12 sps:$4 sm:$0xff]   ;;  %v7120_v62 = vld [vmem:[%s8749_s1 + $0x120] sm:$0xff]  }
  0x20   : > { %6381 = vmatmul.mubr.msk.bf16.vlgmr.msra.gmra.mrb[0].mxu1 %vm670_vm0, %v7059_v14  ;;  %v7547_v53 = vld [vmem:[%s7431_s16 + $0x48] ss:$12 sps:$4 sm:$0xff]   ;;  %v7554_v56 = vld [vmem:[%s7431_s16 + $0x64] ss:$12 sps:$4 sm:$0xff]   ;;  %v7112_v58 = vld [vmem:[%s8749_s1 + $0x118] sm:$0xff]  }
  0x21   : > { %5721 = vmatpush3.bf16.msra.mxu0 %v7061_v16  ;;  %6580 = vmatpush3.bf16.msra.mxu1 %v7062_v17  ;;  %v7102_v57 = vld [vmem:[%s7431_s16 + $0x128] ss:$12 sps:$4 sm:$0xff]   ;;  %v7113_v59 = vld [vmem:[%s8749_s1 + $0xd8] sm:$0xff]   ;;  %v7568_v60 = vld [vmem:[%s7431_s16 + $0x60] ss:$12 sps:$4 sm:$0xff]  }
  0x22   : > { %5722 = vmatprep.subr.bf16.mxu0 %v7063_v18  ;;  %6384 = vmatprep.mubr.msk.bf16.mxu1 %vm670_vm0, %v7065_v20  ;;  %v7104_v61 = vld [vmem:[%s7431_s16 + $0x140] ss:$12 sps:$4 sm:$0xff]   ;;  %v7575_v63 = vld [vmem:[%s7431_s16 + $0x7c] ss:$12 sps:$4 sm:$0xff]   ;;  %v7109_v0 = vld [vmem:[%s7431_s16 + $0x158] ss:$12 sps:$4 sm:$0xff]  }
  0x23   : > { %6573 = vmatprep.subr.bf16.mxu1 %v7068_v23  ;;  %v7583_v1 = vld [vmem:[%s7431_s16 + $0x78] ss:$12 sps:$4 sm:$0xff]   ;;  %v7111_v2 = vld [vmem:[%s7431_s16 + $0x170] ss:$12 sps:$4 sm:$0xff]   ;;  %v7587_v3 = vld [vmem:[%s7431_s16 + $0x94] ss:$12 sps:$4 sm:$0xff]  }
  0x24   : > { %v7590_v4 = vld [vmem:[%s7431_s16 + $0x124] ss:$12 sps:$4 sm:$0xff]   ;;  %v7597_v5 = vld [vmem:[%s7431_s16 + $0x120] ss:$12 sps:$4 sm:$0xff]   ;;  %v7606_v8 = vld [vmem:[%s7431_s16 + $0x13c] ss:$12 sps:$4 sm:$0xff]  }
  0x25   : > { %5723 = vmatpush3.bf16.msra.mxu0 %v7064_v19  ;;  %6581 = vmatpush3.bf16.msra.mxu1 %v7070_v25  ;;  %v7600_v6 = vld [vmem:[%s7431_s16 + $0x90] ss:$12 sps:$4 sm:$0xff]   ;;  %v7603_v7 = vld [vmem:[%s7431_s16 + $0xac] ss:$12 sps:$4 sm:$0xff]   ;;  %v7616_v10 = vld [vmem:[%s7431_s16 + $0xa8] ss:$12 sps:$4 sm:$0xff]  }
  0x26   : > { %5724 = vmatprep.subr.bf16.mxu0 %v7066_v21  ;;  %6574 = vmatprep.subr.bf16.mxu1 %v7078_v32  ;;  %v7127_v9 = vld [vmem:[%s8749_s1 + $0x128] sm:$0xff]   ;;  %v7134_v11 = vld [vmem:[%s8749_s1 + $0x130] sm:$0xff]   ;;  %v7622_v12 = vld [vmem:[%s7431_s16 + $0x138] ss:$12 sps:$4 sm:$0xff]  }
  0x27   : > { %v7625_v13 = vld [vmem:[%s7431_s16 + $0xc4] ss:$12 sps:$4 sm:$0xff]   ;;  %v7628_v14 = vld [vmem:[%s7431_s16 + $0x154] ss:$12 sps:$4 sm:$0xff]   ;;  %v7645_v19 = vld [vmem:[%s7431_s16 + $0xdc] ss:$12 sps:$4 sm:$0xff]  }
  0x28   : > { %6385 = vmatmul.mubr.msk.bf16.gmra.mrb[4].mxu1 %vm670_vm0, %v7067_v22  ;;  %v7638_v16 = vld [vmem:[%s7431_s16 + $0xc0] ss:$12 sps:$4 sm:$0xff]   ;;  %v7651_v21 = vld [vmem:[%s7431_s16 + $0xd8] ss:$12 sps:$4 sm:$0xff]  }
  0x29   : > { %5725 = vmatpush3.bf16.msra.mxu0 %v7069_v24  ;;  %6388 = vmatprep.mubr.msk.bf16.mxu1 %vm670_vm0, %v7076_v30  ;;  %v7153_v18 = vld [vmem:[%s8749_s1 + $0x1c0] sm:$0xff]   ;;  %v7137_v20 = vld [vmem:[%s7431_s16 + $0x16c] ss:$12 sps:$4 sm:$0xff]   ;;  %v7675_v30 = vld [vmem:[%s7431_s16 + $0x108] ss:$12 sps:$4 sm:$0xff]  }
  0x2a   : > { %5726 = vmatprep.subr.bf16.mxu0 %v7071_v26  ;;  %6582 = vmatpush3.bf16.msra.mxu1 %v7079_v33  ;;  %v7174_v22 = vld [vmem:[%s8749_s1 + $0x180] sm:$0xff]   ;;  %v7664_v26 = vld [vmem:[%s7431_s16 + $0xf0] ss:$12 sps:$4 sm:$0xff]  }
  0x2b   : > { %6575 = vmatprep.subr.bf16.mxu1 %v7085_v38  ;;  %v7658_v24 = vld [vmem:[%s7431_s16 + $0xf4] ss:$12 sps:$4 sm:$0xff]   ;;  %v7157_v41 = vld [vmem:[%s7431_s16 + $0x98] ss:$12 sps:$4 sm:$0xff]  }
  0x2c   : > { %v7150_v29 = vld [vmem:[%s7431_s16 + $0x20] ss:$12 sps:$4 sm:$0xff]  }
  0x2d   : > { %5727 = vmatpush3.bf16.msra.mxu0 %v7072_v27  ;;  %v7147_v27 = vld [vmem:[%s7431_s16 + $0x180] ss:$12 sps:$4 sm:$0xff]  }
  0x2e   : > { %5844 = vmatprep.subr.bf16.mxu0 %v7060_v15  ;;  %6583 = vmatpush3.bf16.msra.mxu1 %v7086_v39  ;;  %v7141_v15 = vld [vmem:[%s8749_s1 + $0x138] sm:$0xff]   ;;  %v7701_v40 = vld [vmem:[%s8749_s1 + $0x260] sm:$0xff]  }
  0x2f   : > { %6576 = vmatprep.subr.bf16.mxu1 %v7091_v44 }
  0x30   : > { %752 = vmatmul.mubr.bf16.vlgmr.msra.gmra.mrb[0].mxu0 %v7073_v28  ;;  %6389 = vmatmul.mubr.msk.bf16.gmra.mrb[8].mxu1 %vm670_vm0, %v7077_v31  ;;  %v7668_v28 = vld [vmem:[%s7431_s16 + $0x10c] ss:$12 sps:$4 sm:$0xff]  }
  0x31   : > { %759 = vmatprep.mubr.bf16.mxu0 %v7495_v34  ;;  %6392 = vmatprep.mubr.msk.bf16.mxu1 %vm670_vm0, %v7082_v35  ;;  %v7152_v31 = vld [vmem:[%s7431_s16 + $0x38] ss:$12 sps:$4 sm:$0xff]   ;;  %v7163_v35 = vld [vmem:[%s8749_s1 + $0x1d0] sm:$0xff]  }
  0x32   : > { %5845 = vmatpush3.bf16.msra.mxu0 %v7062_v17  ;;  %6584 = vmatpush3.bf16.msra.mxu1 %v7092_v45  ;;  %v7133_v17 = vld [vmem:[%s7431_s16 + $0x150] ss:$12 sps:$4 sm:$0xff]  }
  0x33   : > { %5846 = vmatprep.subr.bf16.mxu0 %v7068_v23  ;;  %6577 = vmatprep.subr.bf16.mxu1 %v7098_v50  ;;  %v7140_v23 = vld [vmem:[%s7431_s16 + $0x168] ss:$12 sps:$4 sm:$0xff]  }
  0x36   : > { %5847 = vmatpush3.bf16.msra.mxu0 %v7070_v25  ;;  %6585 = vmatpush3.bf16.msra.mxu1 %v7099_v51  ;;  %v7144_v25 = vld [vmem:[%s7431_s16 + $0x184] ss:$12 sps:$4 sm:$0xff]  }
  0x37   : > { %5848 = vmatprep.subr.bf16.mxu0 %v7078_v32  ;;  %6578 = vmatprep.subr.bf16.mxu1 %v7105_v52  ;;  %v7154_v32 = vld [vmem:[%s7431_s16 + $0x50] ss:$12 sps:$4 sm:$0xff]  }
  0x38   : > { %760 = vmatmul.mubr.bf16.gmra.mrb[4].mxu0 %v7502_v36  ;;  %6393 = vmatmul.mubr.msk.bf16.gmra.mrb[12].mxu1 %vm670_vm0, %v7084_v37  ;;  %v7155_v37 = vld [vmem:[%s7431_s16 + $0x68] ss:$12 sps:$4 sm:$0xff]  }
  0x39   : > { %767 = vmatprep.mubr.bf16.mxu0 %v7513_v42  ;;  %6396 = vmatprep.mubr.msk.bf16.mxu1 %vm670_vm0, %v7088_v43  ;;  %v7159_v43 = vld [vmem:[%s7431_s16 + $0xb0] ss:$12 sps:$4 sm:$0xff]  }
  0x3a   : > { %5849 = vmatpush3.bf16.msra.mxu0 %v7079_v33  ;;  %6586 = vmatpush3.bf16.msra.mxu1 %v7106_v54  ;;  %v7158_v33 = vld [vmem:[%s8749_s1 + $0x1c8] sm:$0xff]  }
  0x3b   : > { %5850 = vmatprep.subr.bf16.mxu0 %v7085_v38  ;;  %6579 = vmatprep.subr.bf16.mxu1 %v7112_v58  ;;  %v7156_v38 = vld [vmem:[%s7431_s16 + $0x80] ss:$12 sps:$4 sm:$0xff]  }
  0x3e   : > { %5851 = vmatpush3.bf16.msra.mxu0 %v7086_v39  ;;  %6587 = vmatpush3.bf16.msra.mxu1 %v7113_v59  ;;  %v7168_v39 = vld [vmem:[%s8749_s1 + $0x1d8] sm:$0xff]  }
  0x3f   : > { %5852 = vmatprep.subr.bf16.mxu0 %v7091_v44  ;;  %6412 = vmatprep.subr.bf16.mxu1 %v7120_v62  ;;  %v7160_v44 = vld [vmem:[%s7431_s16 + $0xc8] ss:$12 sps:$4 sm:$0xff]  }
  0x40   : > { %768 = vmatmul.mubr.bf16.gmra.mrb[8].mxu0 %v7531_v49  ;;  %6397 = vmatmul.mubr.msk.bf16.gmra.mrb[16].mxu1 %vm670_vm0, %v7090_v46  ;;  %v7162_v46 = vld [vmem:[%s7431_s16 + $0xf8] ss:$12 sps:$4 sm:$0xff]  }
  0x41   : > { %775 = vmatprep.mubr.bf16.mxu0 %v7528_v47  ;;  %6400 = vmatprep.mubr.msk.bf16.mxu1 %vm670_vm0, %v7095_v48  ;;  %v7164_v48 = vld [vmem:[%s7431_s16 + $0x110] ss:$12 sps:$4 sm:$0xff]  }
  0x42   : > { %5853 = vmatpush3.bf16.msra.mxu0 %v7092_v45  ;;  %v7161_v45 = vld [vmem:[%s7431_s16 + $0xe0] ss:$12 sps:$4 sm:$0xff]  }
  0x43   : > { %5854 = vmatprep.subr.bf16.mxu0 %v7098_v50  ;;  %v7165_v50 = vld [vmem:[%s7431_s16 + $0x128] ss:$12 sps:$4 sm:$0xff]  }
  0x46   : > { %5855 = vmatpush3.bf16.msra.mxu0 %v7099_v51  ;;  %v7166_v51 = vld [vmem:[%s7431_s16 + $0x140] ss:$12 sps:$4 sm:$0xff]  }
  0x47   : > { %5856 = vmatprep.subr.bf16.mxu0 %v7105_v52  ;;  %v7175_v52 = vld [vmem:[%s8749_s1 + $0x140] sm:$0xff]  }
  0x48   : > { %776 = vmatmul.mubr.bf16.gmra.mrb[12].mxu0 %v7547_v53  ;;  %6401 = vmatmul.mubr.msk.bf16.gmra.mrb[20].mxu1 %vm670_vm0, %v7097_v55  ;;  %v7179_v55 = vld [vmem:[%s8749_s1 + $0x148] sm:$0xff]  }
  0x49   : > { %783 = vmatprep.mubr.bf16.mxu0 %v7554_v56  ;;  %6404 = vmatprep.mubr.msk.bf16.mxu1 %vm670_vm0, %v7102_v57  ;;  %v7184_v57 = vld [vmem:[%s8749_s1 + $0x190] sm:$0xff]  }
  0x4a   : > { %5857 = vmatpush3.bf16.msra.mxu0 %v7106_v54  ;;  %v7178_v54 = vld [vmem:[%s8749_s1 + $0x188] sm:$0xff]  }
  0x4b   : > { %5858 = vmatprep.subr.bf16.mxu0 %v7112_v58  ;;  %v7190_v58 = vld [vmem:[%s8749_s1 + $0x198] sm:$0xff]  }
  0x4e   : > { %5859 = vmatpush3.bf16.msra.mxu0 %v7113_v59  ;;  %v7191_v59 = vld [vmem:[%s8749_s1 + $0x158] sm:$0xff]  }
  0x4f   : > { %5976 = vmatprep.subr.bf16.mxu0 %v7174_v22  ;;  %v7183_v22 = vld [vmem:[%s7431_s16 + $0xc8] ss:$12 sps:$4 sm:$0xff]  }
  0x50   : > { %784 = vmatmul.mubr.bf16.gmra.mrb[16].mxu0 %v7568_v60  ;;  %6405 = vmatmul.mubr.msk.bf16.gmra.mrb[24].mxu1 %vm670_vm0, %v7104_v61  ;;  %v7194_v61 = vld [vmem:[%s8749_s1 + $0x1a0] sm:$0xff]  }
  0x51   : > { %791 = vmatprep.mubr.bf16.mxu0 %v7575_v63  ;;  %6408 = vmatprep.mubr.msk.bf16.mxu1 %vm670_vm0, %v7109_v0  ;;  %v7171_v0 = vld [vmem:[%s7431_s16 + $0x38] ss:$12 sps:$4 sm:$0xff]  }
  0x58   : > { %792 = vmatmul.mubr.bf16.gmra.mrb[20].mxu0 %v7583_v1  ;;  %6409 = vmatmul.mubr.msk.bf16.gmra.mrb[28].mxu1 %vm670_vm0, %v7111_v2  ;;  %v7195_v2 = vld [vmem:[%s8749_s1 + $0x160] sm:$0xff]  }
  0x59   : > { %799 = vmatprep.mubr.bf16.mxu0 %v7587_v3  ;;  %1710 = vmatprep.mubr.bf16.mxu1 %v7590_v4 }
  0x60   : > { %800 = vmatmul.mubr.bf16.gmra.mrb[24].mxu0 %v7600_v6  ;;  %1711 = vmatmul.mubr.bf16.vlgmr.msra.gmra.mrb[32].mxu1 %v7597_v5 }
  0x61   : > { %6413 = vmatpush3.bf16.msra.mxu1 %v7120_v62  ;;  %807 = vmatprep.mubr.bf16.mxu0 %v7603_v7  ;;  %v7170_v62 = vld [vmem:[%s7431_s16 + $0x188] ss:$12 sps:$4 sm:$0xff]  }
  0x62   : > { %1718 = vmatprep.mubr.bf16.mxu1 %v7606_v8  ;;  %6414 = vmatprep.subr.bf16.mxu1 %v7127_v9 }
  0x65   : > { %6415 = vmatpush3.bf16.msra.mxu1 %v7127_v9  ;;  %v7182_v9 = vld [vmem:[%s8749_s1 + $0x268] sm:$0xff]  }
  0x66   : > { %6416 = vmatprep.subr.bf16.mxu1 %v7134_v11 }
  0x68   : > { %808 = vmatmul.mubr.bf16.gmra.mrb[28].mxu0 %v7616_v10  ;;  %1719 = vmatmul.mubr.bf16.gmra.mrb[36].mxu1 %v7622_v12 }
  0x69   : > { %815 = vmatprep.mubr.bf16.mxu0 %v7625_v13  ;;  %1726 = vmatprep.mubr.bf16.mxu1 %v7628_v14 }
  0x6a   : > { %6417 = vmatpush3.bf16.msra.mxu1 %v7134_v11  ;;  %v7189_v11 = vld [vmem:[%s8749_s1 + $0x270] sm:$0xff]  }
  0x6b   : > { %6418 = vmatprep.subr.bf16.mxu1 %v7141_v15 }
  0x6e   : > { %6419 = vmatpush3.bf16.msra.mxu1 %v7141_v15  ;;  %v7180_v15 = vld [vmem:[%s7431_s16 + $0x98] ss:$12 sps:$4 sm:$0xff]  }
  0x6f   : > { %6452 = vmatprep.subr.bf16.mxu1 %v7153_v18 }
  0x70   : > { %816 = vmatmul.mubr.bf16.gmra.mrb[32].mxu0 %v7638_v16  ;;  %1727 = vmatmul.mubr.bf16.gmra.mrb[40].mxu1 %v7133_v17 }
  0x71   : > { %823 = vmatprep.mubr.bf16.mxu0 %v7645_v19  ;;  %1734 = vmatprep.mubr.bf16.mxu1 %v7137_v20 }
  0x78   : > { %824 = vmatmul.mubr.bf16.gmra.mrb[36].mxu0 %v7651_v21  ;;  %1735 = vmatmul.mubr.bf16.gmra.mrb[44].mxu1 %v7140_v23 }
  0x79   : > { %831 = vmatprep.mubr.bf16.mxu0 %v7658_v24  ;;  %1742 = vmatprep.mubr.bf16.mxu1 %v7144_v25  ;;  %v7328_v25 = vld [vmem:[%s7431_s16 + $0x3c] sm:$0xff] }
  0x80   : > { %832 = vmatmul.mubr.bf16.gmra.mrb[40].mxu0 %v7664_v26  ;;  %1743 = vmatmul.mubr.bf16.gmra.mrb[48].mxu1 %v7147_v27 }
  0x81   : > { %839 = vmatprep.mubr.bf16.mxu0 %v7668_v28  ;;  %6420 = vmatprep.mubr.msk.bf16.mxu1 %vm670_vm0, %v7150_v29  ;;  %v7208_v29 = vld [vmem:[%s7431_s16 + $0x50] ss:$12 sps:$4 sm:$0xff]  }
  0x88   : > { %840 = vmatmul.mubr.bf16.gmra.mrb[44].mxu0 %v7675_v30  ;;  %6421 = vmatmul.mubr.msk.bf16.vlgmr.msra.gmra.mrb[0].mxu1 %vm670_vm0, %v7152_v31 }
  0x89   : > { %6453 = vmatpush3.bf16.msra.mxu1 %v7153_v18  ;;  %847 = vmatprep.mubr.bf16.mxu0 %v7590_v4  ;;  %v7200_v4 = vld [vmem:[%s8749_s1 + $0x168] sm:$0xff]   ;;  %v7181_v18 = vld [vmem:[%s7431_s16 + $0xb0] ss:$12 sps:$4 sm:$0xff]  }
  0x8a   : > { %6424 = vmatprep.mubr.msk.bf16.mxu1 %vm670_vm0, %v7154_v32  ;;  %6454 = vmatprep.subr.bf16.mxu1 %v7158_v33 }
  0x8d   : > { %6455 = vmatpush3.bf16.msra.mxu1 %v7158_v33 }
  0x8e   : > { %6456 = vmatprep.subr.bf16.mxu1 %v7163_v35 }
  0x90   : > { %848 = vmatmul.mubr.bf16.gmra.mrb[48].mxu0 %v7597_v5  ;;  %6425 = vmatmul.mubr.msk.bf16.gmra.mrb[4].mxu1 %vm670_vm0, %v7155_v37  ;;  %v7172_v5 = vld [vmem:[%s7431_s16 + $0x50] ss:$12 sps:$4 sm:$0xff]  }
  0x91   : > { %855 = vmatprep.mubr.bf16.mxu0 %v7606_v8  ;;  %6428 = vmatprep.mubr.msk.bf16.mxu1 %vm670_vm0, %v7156_v38  ;;  %v7202_v8 = vld [vmem:[%s8749_s1 + $0x1b0] sm:$0xff]  }
  0x92   : > { %6457 = vmatpush3.bf16.msra.mxu1 %v7163_v35  ;;  %v7212_v35 = vld [vmem:[%s7431_s16 + $0x80] ss:$12 sps:$4 sm:$0xff]  }
  0x93   : > { %6458 = vmatprep.subr.bf16.mxu1 %v7168_v39 }
  0x96   : > { %6459 = vmatpush3.bf16.msra.mxu1 %v7168_v39  ;;  %v7228_v39 = vld [vmem:[%s8749_s1 + $0x1e0] sm:$0xff]  }
  0x97   : > { %6492 = vmatprep.subr.bf16.mxu1 %v7701_v40 }
  0x98   : > { %856 = vmatmul.mubr.bf16.gmra.mrb[52].mxu0 %v7622_v12  ;;  %6429 = vmatmul.mubr.msk.bf16.gmra.mrb[8].mxu1 %vm670_vm0, %v7157_v41  ;;  %v7205_v12 = vld [vmem:[%s8749_s1 + $0x1b8] sm:$0xff]  }
  0x99   : > { %863 = vmatprep.mubr.bf16.mxu0 %v7628_v14  ;;  %6432 = vmatprep.mubr.msk.bf16.mxu1 %vm670_vm0, %v7159_v43  ;;  %v7206_v14 = vld [vmem:[%s8749_s1 + $0x178] sm:$0xff]   ;;  %v7215_v43 = vld [vmem:[%s8749_s1 + $0x288] sm:$0xff]  }
  0x9a   : > { %v7329_v41 = vld [vmem:[%s7431_s16 + $0x4c] ss:$12 sps:$4 sm:$0xff]  }
  0xa0   : > { %864 = vmatmul.mubr.bf16.gmra.mrb[56].mxu0 %v7133_v17  ;;  %6433 = vmatmul.mubr.msk.bf16.gmra.mrb[12].mxu1 %vm670_vm0, %v7160_v44  ;;  %v7198_v17 = vld [vmem:[%s8749_s1 + $0x278] sm:$0xff]  }
  0xa1   : > { %871 = vmatprep.mubr.bf16.mxu0 %v7137_v20  ;;  %6436 = vmatprep.mubr.msk.bf16.mxu1 %vm670_vm0, %v7161_v45  ;;  %v7210_v20 = vld [vmem:[%s8749_s1 + $0x2c0] sm:$0xff]   ;;  %v7244_v45 = vld [vmem:[%s8749_s1 + $0x1e8] sm:$0xff]  }
  0xa8   : > { %872 = vmatmul.mubr.bf16.gmra.mrb[60].mxu0 %v7140_v23  ;;  %6437 = vmatmul.mubr.msk.bf16.gmra.mrb[16].mxu1 %vm670_vm0, %v7162_v46  ;;  %v7192_v23 = vld [vmem:[%s7431_s16 + $0x128] ss:$12 sps:$4 sm:$0xff]   ;;  %v7213_v46 = vld [vmem:[%s7431_s16 + $0x98] ss:$12 sps:$4 sm:$0xff]  }
  0xa9   : > { %1622 = vmatprep.mubr.bf16.mxu0 %v7495_v34  ;;  %6440 = vmatprep.mubr.msk.bf16.mxu1 %vm670_vm0, %v7164_v48  ;;  %v7167_v34 = vld [vmem:[%s7431_s16 + $0x158] ss:$12 sps:$4 sm:$0xff]  }
  0xb0   : > { %1623 = vmatmul.mubr.bf16.vlgmr.msra.gmra.mrb[64].mxu0 %v7502_v36  ;;  %6441 = vmatmul.mubr.msk.bf16.gmra.mrb[20].mxu1 %vm670_vm0, %v7165_v50  ;;  %v7169_v36 = vld [vmem:[%s7431_s16 + $0x170] ss:$12 sps:$4 sm:$0xff]  }
  0xb1   : > { %1630 = vmatprep.mubr.bf16.mxu0 %v7513_v42  ;;  %6444 = vmatprep.mubr.msk.bf16.mxu1 %vm670_vm0, %v7166_v51  ;;  %v7186_v42 = vld [vmem:[%s8749_s1 + $0x150] sm:$0xff]  }
  0xb2   : > { %5977 = vmatpush3.bf16.msra.mxu0 %v7175_v52  ;;  %v7216_v50 = vld [vmem:[%s7431_s16 + $0xb0] ss:$12 sps:$4 sm:$0xff]  }
  0xb3   : > { %5978 = vmatprep.subr.bf16.mxu0 %v7178_v54  ;;  %v7219_v54 = vld [vmem:[%s8749_s1 + $0x290] sm:$0xff]  }
  0xb6   : > { %5979 = vmatpush3.bf16.msra.mxu0 %v7179_v55  ;;  %v7259_v55 = vld [vmem:[%s8749_s1 + $0x230] sm:$0xff]  }
  0xb7   : > { %5980 = vmatprep.subr.bf16.mxu0 %v7184_v57  ;;  %v7225_v57 = vld [vmem:[%s8749_s1 + $0x2d8] sm:$0xff]  }
  0xb8   : > { %1631 = vmatmul.mubr.bf16.gmra.mrb[68].mxu0 %v7531_v49  ;;  %6445 = vmatmul.mubr.msk.bf16.gmra.mrb[24].mxu1 %vm670_vm0, %v7167_v34 }
  0xb9   : > { %1638 = vmatprep.mubr.bf16.mxu0 %v7528_v47  ;;  %6448 = vmatprep.mubr.msk.bf16.mxu1 %vm670_vm0, %v7169_v36  ;;  %v7199_v47 = vld [vmem:[%s8749_s1 + $0x1a8] sm:$0xff]  }
  0xba   : > { %5981 = vmatpush3.bf16.msra.mxu0 %v7186_v42  ;;  %v7260_v42 = vld [vmem:[%s8749_s1 + $0x1f0] sm:$0xff]  }
  0xbb   : > { %5982 = vmatprep.subr.bf16.mxu0 %v7190_v58  ;;  %v7330_v58 = vld [vmem:[%s7431_s16 + $0x48] ss:$12 sps:$4 sm:$0xff]  }
  0xbe   : > { %5983 = vmatpush3.bf16.msra.mxu0 %v7191_v59  ;;  %v7271_v59 = vld [vmem:[%s8749_s1 + $0x238] sm:$0xff]  }
  0xbf   : > { %5984 = vmatprep.subr.bf16.mxu0 %v7194_v61  ;;  %v7331_v61 = vld [vmem:[%s7431_s16 + $0x64] ss:$12 sps:$4 sm:$0xff]  }
  0xc0   : > { %1639 = vmatmul.mubr.bf16.gmra.mrb[72].mxu0 %v7547_v53  ;;  %6449 = vmatmul.mubr.msk.bf16.gmra.mrb[28].mxu1 %vm670_vm0, %v7170_v62  ;;  %v7176_v53 = vld [vmem:[%s7431_s16 + $0x68] ss:$12 sps:$4 sm:$0xff]   ;;  %v7226_v62 = vld [vmem:[%s8749_s1 + $0x298] sm:$0xff]  }
  0xc1   : > { %1646 = vmatprep.mubr.bf16.mxu0 %v7554_v56  ;;  %6460 = vmatprep.mubr.msk.bf16.mxu1 %vm670_vm0, %v7171_v0  ;;  %v7204_v56 = vld [vmem:[%s8749_s1 + $0x170] sm:$0xff]   ;;  %v7234_v0 = vld [vmem:[%s8749_s1 + $0x2e0] sm:$0xff]  }
  0xc2   : > { %5985 = vmatpush3.bf16.msra.mxu0 %v7195_v2 }
  0xc3   : > { %5986 = vmatprep.subr.bf16.mxu0 %v7199_v47  ;;  %v7272_v47 = vld [vmem:[%s8749_s1 + $0x1f8] sm:$0xff]  }
  0xc6   : > { %5987 = vmatpush3.bf16.msra.mxu0 %v7200_v4  ;;  %v7217_v4 = vld [vmem:[%s7431_s16 + $0xc8] ss:$12 sps:$4 sm:$0xff]  }
  0xc7   : > { %5988 = vmatprep.subr.bf16.mxu0 %v7202_v8  ;;  %v7914_v8 = vld [vmem:[%s7431_s16 + $0x7c] ss:$12 sps:$4 sm:$0xff]  }
  0xc8   : > { %1647 = vmatmul.mubr.bf16.gmra.mrb[76].mxu0 %v7568_v60  ;;  %6461 = vmatmul.mubr.msk.bf16.vlgmr.msra.gmra.mrb[0].mxu1 %vm670_vm0, %v7172_v5  ;;  %v7177_v60 = vld [vmem:[%s7431_s16 + $0x80] ss:$12 sps:$4 sm:$0xff]  }
  0xc9   : > { %6493 = vmatpush3.bf16.msra.mxu1 %v7701_v40  ;;  %1654 = vmatprep.mubr.bf16.mxu0 %v7575_v63  ;;  %v7227_v63 = vld [vmem:[%s8749_s1 + $0x220] sm:$0xff]   ;;  %v7243_v40 = vld [vmem:[%s8749_s1 + $0x228] sm:$0xff]  }
  0xca   : > { %6464 = vmatprep.mubr.msk.bf16.mxu1 %vm670_vm0, %v7176_v53  ;;  %6494 = vmatprep.subr.bf16.mxu1 %v7182_v9  ;;  %v7222_v53 = vld [vmem:[%s7431_s16 + $0xe0] ss:$12 sps:$4 sm:$0xff]  }
  0xcb   : > { %5989 = vmatpush3.bf16.msra.mxu0 %v7204_v56 }
  0xcc   : > { %5990 = vmatprep.subr.bf16.mxu0 %v7205_v12 }
  0xcd   : > { %6495 = vmatpush3.bf16.msra.mxu1 %v7182_v9 }
  0xce   : > { %6496 = vmatprep.subr.bf16.mxu1 %v7189_v11 }
  0xcf   : > { %5991 = vmatpush3.bf16.msra.mxu0 %v7206_v14  ;;  %v7279_v14 = vld [vmem:[%s8749_s1 + $0x240] sm:$0xff]  }
  0xd0   : > { %1655 = vmatmul.mubr.bf16.gmra.mrb[80].mxu0 %v7583_v1  ;;  %6465 = vmatmul.mubr.msk.bf16.gmra.mrb[4].mxu1 %vm670_vm0, %v7177_v60  ;;  %v7185_v1 = vld [vmem:[%s7431_s16 + $0xe0] ss:$12 sps:$4 sm:$0xff]  }
  0xd1   : > { %1662 = vmatprep.mubr.bf16.mxu0 %v7587_v3  ;;  %6468 = vmatprep.mubr.msk.bf16.mxu1 %vm670_vm0, %v7180_v15  ;;  %v7187_v3 = vld [vmem:[%s7431_s16 + $0xf8] ss:$12 sps:$4 sm:$0xff]   ;;  %v7241_v15 = vld [vmem:[%s8749_s1 + $0x2e8] sm:$0xff]  }
  0xd2   : > { %6497 = vmatpush3.bf16.msra.mxu1 %v7189_v11  ;;  %6108 = vmatprep.subr.bf16.mxu0 %v7227_v63  ;;  %v7235_v11 = vld [vmem:[%s8749_s1 + $0x2a0] sm:$0xff]  }
  0xd3   : > { %6498 = vmatprep.subr.bf16.mxu1 %v7198_v17  ;;  %v7332_v63 = vld [vmem:[%s7431_s16 + $0x60] ss:$12 sps:$4 sm:$0xff]  }
  0xd6   : > { %6499 = vmatpush3.bf16.msra.mxu1 %v7198_v17  ;;  %v7280_v17 = vld [vmem:[%s8749_s1 + $0x200] sm:$0xff]  }
  0xd7   : > { %6240 = vmatprep.subr.bf16.mxu1 %v7210_v20  ;;  %v7242_v20 = vld [vmem:[%s8749_s1 + $0x2a8] sm:$0xff]  }
  0xd8   : > { %1663 = vmatmul.mubr.bf16.gmra.mrb[84].mxu0 %v7600_v6  ;;  %6469 = vmatmul.mubr.msk.bf16.gmra.mrb[8].mxu1 %vm670_vm0, %v7181_v18  ;;  %v7188_v6 = vld [vmem:[%s7431_s16 + $0x110] ss:$12 sps:$4 sm:$0xff]   ;;  %v7288_v18 = vld [vmem:[%s8749_s1 + $0x248] sm:$0xff]  }
  0xd9   : > { %1670 = vmatprep.mubr.bf16.mxu0 %v7603_v7  ;;  %6472 = vmatprep.mubr.msk.bf16.mxu1 %vm670_vm0, %v7183_v22  ;;  %v7193_v7 = vld [vmem:[%s7431_s16 + $0x140] ss:$12 sps:$4 sm:$0xff]  }
  0xe0   : > { %1671 = vmatmul.mubr.bf16.gmra.mrb[88].mxu0 %v7616_v10  ;;  %6473 = vmatmul.mubr.msk.bf16.gmra.mrb[12].mxu1 %vm670_vm0, %v7185_v1  ;;  %v7196_v10 = vld [vmem:[%s7431_s16 + $0x158] ss:$12 sps:$4 sm:$0xff]   ;;  %v7250_v1 = vld [vmem:[%s8749_s1 + $0x2f0] sm:$0xff]  }
  0xe1   : > { %1678 = vmatprep.mubr.bf16.mxu0 %v7625_v13  ;;  %6476 = vmatprep.mubr.msk.bf16.mxu1 %vm670_vm0, %v7187_v3  ;;  %v7197_v13 = vld [vmem:[%s7431_s16 + $0x170] ss:$12 sps:$4 sm:$0xff]   ;;  %v7289_v3 = vld [vmem:[%s8749_s1 + $0x208] sm:$0xff]  }
  0xe8   : > { %1679 = vmatmul.mubr.bf16.gmra.mrb[92].mxu0 %v7638_v16  ;;  %6477 = vmatmul.mubr.msk.bf16.gmra.mrb[16].mxu1 %vm670_vm0, %v7188_v6  ;;  %v7201_v16 = vld [vmem:[%s7431_s16 + $0x188] ss:$12 sps:$4 sm:$0xff]   ;;  %v7950_v6 = vld [vmem:[%s7431_s16 + $0x78] ss:$12 sps:$4 sm:$0xff]  }
  0xe9   : > { %1686 = vmatprep.mubr.bf16.mxu0 %v7645_v19  ;;  %6480 = vmatprep.mubr.msk.bf16.mxu1 %vm670_vm0, %v7192_v23  ;;  %v7203_v19 = vld [vmem:[%s7431_s16 + $0x1a0] ss:$12 sps:$4 sm:$0xff]   ;;  %v7224_v23 = vld [vmem:[%s7431_s16 + $0xf8] ss:$12 sps:$4 sm:$0xff]  }
  0xf0   : > { %1687 = vmatmul.mubr.bf16.gmra.mrb[96].mxu0 %v7651_v21  ;;  %6481 = vmatmul.mubr.msk.bf16.gmra.mrb[20].mxu1 %vm670_vm0, %v7193_v7  ;;  %v7327_v21 = vld [vmem:[%s7431_s16 + $0x30] sm:$0xff] }
  0xf1   : > { %1694 = vmatprep.mubr.bf16.mxu0 %v7658_v24  ;;  %6484 = vmatprep.mubr.msk.bf16.mxu1 %vm670_vm0, %v7196_v10  ;;  %v5218_v27 = vcombine.high %v7327_v21, %v7328_v25  ;;  %v7954_v10 = vld [vmem:[%s7431_s16 + $0x94] ss:$12 sps:$4 sm:$0xff]  }
  0xf2   : > { %v7251_v25 = vld [vmem:[%s8749_s1 + $0x2b0] sm:$0xff]  }
  0xf8   : > { %1695 = vmatmul.mubr.bf16.gmra.mrb[100].mxu0 %v7664_v26  ;;  %6485 = vmatmul.mubr.msk.bf16.gmra.mrb[24].mxu1 %vm670_vm0, %v7197_v13  ;;  %v7209_v26 = vld [vmem:[%s7431_s16 + $0x68] ss:$12 sps:$4 sm:$0xff]   ;;  %v7231_v13 = vld [vmem:[%s7431_s16 + $0x110] ss:$12 sps:$4 sm:$0xff]  }
  0xf9   : > { %1702 = vmatprep.mubr.bf16.mxu0 %v7668_v28  ;;  %6488 = vmatprep.mubr.msk.bf16.mxu1 %vm670_vm0, %v7201_v16  ;;  %v7211_v28 = vld [vmem:[%s8749_s1 + $0x280] sm:$0xff]  }
 0x100   : > { %1703 = vmatmul.mubr.bf16.gmra.mrb[104].mxu0 %v7675_v30  ;;  %6489 = vmatmul.mubr.msk.bf16.gmra.mrb[28].mxu1 %vm670_vm0, %v7203_v19  ;;  %v7214_v30 = vld [vmem:[%s8749_s1 + $0x2c8] sm:$0xff]  }
 0x101   : > { %2493 = vmatprep.mubr.bf16.mxu0 %v5218_v27  ;;  %6500 = vmatprep.mubr.msk.bf16.mxu1 %vm670_vm0, %v7208_v29  ;;  %v7296_v27 = vld [vmem:[%s8749_s1 + $0x250] sm:$0xff]  }
 0x103   : > { %v5728_v24 = vpop.f32.mrb[0].mxu0 }
 0x104   : > { %v5729_v31 = vpop.f32.mrb[1].mxu0 }
 0x105   : > { %v7851_v32 = vadd.f32 %v5729_v31, %v5728_v24  ;;  %v5731_v33 = vpop.f32.mrb[2].mxu0  ;;  %v7257_v24 = vld [vmem:[%s8749_s1 + $0x2f8] sm:$0xff]  }
 0x106   : > { %v5732_v37 = vpop.f32.mrb[3].mxu0  ;;  %v7298_v31 = vld [vmem:[%s8749_s1 + $0x258] sm:$0xff]  }
 0x107   : > { %v7857_v38 = vadd.f32 %v5732_v37, %v5731_v33  ;;  %v7992_v37 = vld [vmem:[%s7431_s16 + $0x90] ss:$12 sps:$4 sm:$0xff]  }
 0x108   : > { %2494 = vmatmul.mubr.bf16.vlgmr.msra.gmra.mrb[108].mxu0 %v7531_v49  ;;  %6501 = vmatmul.mubr.msk.bf16.vlgmr.msra.gmra.mrb[0].mxu1 %vm670_vm0, %v7209_v26  ;;  %v7218_v49 = vld [vmem:[%s8749_s1 + $0x2d0] sm:$0xff]  }
 0x109   : > { %6241 = vmatpush3.bf16.msra.mxu1 %v7211_v28  ;;  %2501 = vmatprep.mubr.bf16.mxu0 %v7329_v41  ;;  %v7297_v26 = vld [vmem:[%s8749_s1 + $0x210] sm:$0xff]   ;;  %v7258_v28 = vld [vmem:[%s8749_s1 + $0x2b8] sm:$0xff]  }
 0x10a   : > { %6504 = vmatprep.mubr.msk.bf16.mxu1 %vm670_vm0, %v7212_v35  ;;  %6242 = vmatprep.subr.bf16.mxu1 %v7214_v30  ;;  %v7986_v35 = vld [vmem:[%s8749_s1 + $0x300] sm:$0xff]   ;;  %v7299_v30 = vld [vmem:[%s8749_s1 + $0x218] sm:$0xff]  }
 0x10b   : > { %v5734_v44 = vpop.f32.mrb[4].mxu0  ;;  %6109 = vmatpush3.bf16.msra.mxu0 %v7228_v39  ;;  %v7233_v39 = vld [vmem:[%s7431_s16 + $0x128] ss:$12 sps:$4 sm:$0xff]   ;;  %v7996_v41 = vld [vmem:[%s7431_s16 + $0xac] ss:$12 sps:$4 sm:$0xff]  }
 0x10c   : > { %v5735_v48 = vpop.f32.mrb[5].mxu0  ;;  %6110 = vmatprep.subr.bf16.mxu0 %v7243_v40 }
 0x10d   : > { %6243 = vmatpush3.bf16.msra.mxu1 %v7215_v43  ;;  %v7880_v51 = vadd.f32 %v5735_v48, %v5734_v44  ;;  %v5737_v52 = vpop.f32.mrb[6].mxu0  ;;  %v7238_v43 = vld [vmem:[%s7431_s16 + $0x140] ss:$12 sps:$4 sm:$0xff]  }
 0x10e   : > { %6244 = vmatprep.subr.bf16.mxu1 %v7218_v49  ;;  %v5738_v34 = vpop.f32.mrb[7].mxu0 }
 0x10f   : > { %v7891_v36 = vadd.f32 %v5738_v34, %v5737_v52  ;;  %6111 = vmatpush3.bf16.msra.mxu0 %v7244_v45  ;;  %v7240_v52 = vld [vmem:[%s7431_s16 + $0x158] ss:$12 sps:$4 sm:$0xff]  }
 0x110   : > { %2502 = vmatmul.mubr.bf16.gmra.mrb[112].mxu0 %v7330_v58  ;;  %6505 = vmatmul.mubr.msk.bf16.gmra.mrb[4].mxu1 %vm670_vm0, %v7213_v46  ;;  %v8013_v34 = vld [vmem:[%s7431_s16 + $0xc4] ss:$12 sps:$4 sm:$0xff]  }
 0x111   : > { %2509 = vmatprep.mubr.bf16.mxu0 %v7331_v61  ;;  %6508 = vmatprep.mubr.msk.bf16.mxu1 %vm670_vm0, %v7216_v50  ;;  %v8009_v50 = vld [vmem:[%s7431_s16 + $0xa8] ss:$12 sps:$4 sm:$0xff]  }
 0x112   : > { %6245 = vmatpush3.bf16.msra.mxu1 %v7219_v54  ;;  %6112 = vmatprep.subr.bf16.mxu0 %v7259_v55  ;;  %v7247_v55 = vld [vmem:[%s7431_s16 + $0x170] ss:$12 sps:$4 sm:$0xff]  }
 0x113   : > { %6246 = vmatprep.subr.bf16.mxu1 %v7225_v57  ;;  %v5740_v2 = vpop.f32.mrb[8].mxu0  ;;  %6113 = vmatpush3.bf16.msra.mxu0 %v7260_v42 }
 0x114   : > { %v5741_v5 = vpop.f32.mrb[9].mxu0  ;;  %6114 = vmatprep.subr.bf16.mxu0 %v7271_v59 }
 0x115   : > { %v7917_v9 = vadd.f32 %v5741_v5, %v5740_v2  ;;  %v5743_v56 = vpop.f32.mrb[10].mxu0  ;;  %v8025_v2 = vld [vmem:[%s7431_s16 + $0xc0] ss:$12 sps:$4 sm:$0xff]  }
 0x116   : > { %6247 = vmatpush3.bf16.msra.mxu1 %v7226_v62  ;;  %v5744_v12 = vpop.f32.mrb[11].mxu0 }
 0x117   : > { %6248 = vmatprep.subr.bf16.mxu1 %v7234_v0  ;;  %v7925_v60 = vadd.f32 %v5744_v12, %v5743_v56  ;;  %6115 = vmatpush3.bf16.msra.mxu0 %v7272_v47  ;;  %v7249_v47 = vld [vmem:[%s7431_s16 + $0x188] ss:$12 sps:$4 sm:$0xff]  }
 0x118   : > { %2510 = vmatmul.mubr.bf16.gmra.mrb[116].mxu0 %v7332_v63  ;;  %6509 = vmatmul.mubr.msk.bf16.gmra.mrb[8].mxu1 %vm670_vm0, %v7217_v4  ;;  %v8031_v56 = vld [vmem:[%s7431_s16 + $0xdc] ss:$12 sps:$4 sm:$0xff]  }
 0x119   : > { %2517 = vmatprep.mubr.bf16.mxu0 %v7914_v8  ;;  %6512 = vmatprep.mubr.msk.bf16.mxu1 %vm670_vm0, %v7222_v53 }
 0x11a   : > { %6249 = vmatpush3.bf16.msra.mxu1 %v7235_v11  ;;  %6116 = vmatprep.subr.bf16.mxu0 %v7279_v14  ;;  %v7254_v11 = vld [vmem:[%s7431_s16 + $0x1a0] ss:$12 sps:$4 sm:$0xff]  }
 0x11b   : > { %6250 = vmatprep.subr.bf16.mxu1 %v7241_v15  ;;  %v5746_v22 = vpop.f32.mrb[12].mxu0  ;;  %6117 = vmatpush3.bf16.msra.mxu0 %v7280_v17 }
 0x11c   : > { %v5747_v7 = vpop.f32.mrb[13].mxu0  ;;  %6118 = vmatprep.subr.bf16.mxu0 %v7288_v18 }
 0x11d   : > { %v7957_v16 = vadd.f32 %v5747_v7, %v5746_v22  ;;  %v5749_v19 = vpop.f32.mrb[14].mxu0 }
 0x11e   : > { %6251 = vmatpush3.bf16.msra.mxu1 %v7242_v20  ;;  %v5750_v21 = vpop.f32.mrb[15].mxu0 }
 0x11f   : > { %v7965_v29 = vadd.f32 %v5750_v21, %v5749_v19  ;;  %6252 = vmatprep.subr.bf16.mxu1 %v7250_v1  ;;  %6119 = vmatpush3.bf16.msra.mxu0 %v7289_v3  ;;  %v8045_v3 = vld [vmem:[%s7431_s16 + $0xd8] ss:$12 sps:$4 sm:$0xff]   ;;  %v8051_v21 = vld [vmem:[%s7431_s16 + $0xf4] ss:$12 sps:$4 sm:$0xff]  }
 0x120   : > { %2518 = vmatmul.mubr.bf16.gmra.mrb[120].mxu0 %v7950_v6  ;;  %6513 = vmatmul.mubr.msk.bf16.gmra.mrb[12].mxu1 %vm670_vm0, %v7224_v23  ;;  %v7256_v23 = vld [vmem:[%s7431_s16 + $0x1b8] ss:$12 sps:$4 sm:$0xff]  }
 0x121   : > { %2525 = vmatprep.mubr.bf16.mxu0 %v7954_v10  ;;  %6516 = vmatprep.mubr.msk.bf16.mxu1 %vm670_vm0, %v7231_v13 }
 0x122   : > { %6253 = vmatpush3.bf16.msra.mxu1 %v7251_v25  ;;  %6120 = vmatprep.subr.bf16.mxu0 %v7296_v27  ;;  %v8054_v25 = vld [vmem:[%s7431_s16 + $0x64] ss:$12 sps:$4 sm:$0xff]  }
 0x123   : > { %v5752_v33 = vpop.f32.mrb[16].mxu0  ;;  %6254 = vmatprep.subr.bf16.mxu1 %v7257_v24  ;;  %6121 = vmatpush3.bf16.msra.mxu0 %v7297_v26 }
 0x124   : > { %v5753_v40 = vpop.f32.mrb[17].mxu0  ;;  %6122 = vmatprep.subr.bf16.mxu0 %v7298_v31 }
 0x125   : > { %v7999_v49 = vadd.f32 %v5753_v40, %v5752_v33  ;;  %v5755_v44 = vpop.f32.mrb[18].mxu0 }
 0x126   : > { %v5756_v45 = vpop.f32.mrb[19].mxu0  ;;  %6255 = vmatpush3.bf16.msra.mxu1 %v7258_v28 }
 0x127   : > { %v8001_v46 = vadd.f32 %v5756_v45, %v5755_v44  ;;  %6532 = vmatprep.subr.bf16.mxu1 %v7986_v35  ;;  %6123 = vmatpush3.bf16.msra.mxu0 %v7299_v30  ;;  %v8070_v44 = vld [vmem:[%s7431_s16 + $0xf0] ss:$12 sps:$4 sm:$0xff]  }
 0x128   : > { %2526 = vmatmul.mubr.bf16.gmra.mrb[124].mxu0 %v7992_v37  ;;  %6517 = vmatmul.mubr.msk.bf16.gmra.mrb[16].mxu1 %vm670_vm0, %v7233_v39 }
 0x129   : > { %2533 = vmatprep.mubr.bf16.mxu0 %v7996_v41  ;;  %6520 = vmatprep.mubr.msk.bf16.mxu1 %vm670_vm0, %v7238_v43  ;;  %v8067_v43 = vld [vmem:[%s7431_s16 + $0x60] ss:$12 sps:$4 sm:$0xff]  }
 0x12b   : > { %v5758_v48 = vpop.f32.mrb[20].mxu0 }
 0x12c   : > { %v5759_v54 = vpop.f32.mrb[21].mxu0 }
 0x12d   : > { %v8016_v57 = vadd.f32 %v5759_v54, %v5758_v48  ;;  %v5761_v42 = vpop.f32.mrb[22].mxu0  ;;  %v8075_v54 = vld [vmem:[%s7431_s16 + $0x10c] ss:$12 sps:$4 sm:$0xff]  }
 0x12e   : > { %v5762_v58 = vpop.f32.mrb[23].mxu0 }
 0x12f   : > { %v8018_v59 = vadd.f32 %v5762_v58, %v5761_v42 }
 0x130   : > { %2534 = vmatmul.mubr.bf16.gmra.mrb[128].mxu0 %v8009_v50  ;;  %6521 = vmatmul.mubr.msk.bf16.gmra.mrb[20].mxu1 %vm670_vm0, %v7240_v52 }
 0x131   : > { %2541 = vmatprep.mubr.bf16.mxu0 %v8013_v34  ;;  %6524 = vmatprep.mubr.msk.bf16.mxu1 %vm670_vm0, %v7247_v55 }
 0x133   : > { %v5926_v61 = vpop.f32.mrb[32].mxu1  ;;  %v5764_v62 = vpop.f32.mrb[24].mxu0 }
 0x134   : > { %v5927_v0 = vpop.f32.mrb[33].mxu1  ;;  %v5765_v4 = vpop.f32.mrb[25].mxu0 }
 0x135   : > { %v8028_v5 = vadd.f32 %v5927_v0, %v5926_v61  ;;  %v5929_v53 = vpop.f32.mrb[34].mxu1  ;;  %v8034_v12 = vadd.f32 %v5765_v4, %v5764_v62  ;;  %v5767_v14 = vpop.f32.mrb[26].mxu0  ;;  %v7284_v62 = vld [vmem:[%s8749_s1 + $0x308] sm:$0xff]   ;;  %v7303_v4 = vld [vmem:[%s8749_s1 + $0x310] sm:$0xff]  }
 0x136   : > { %v5930_v15 = vpop.f32.mrb[35].mxu1  ;;  %v5768_v17 = vpop.f32.mrb[27].mxu0 }
 0x137   : > { %v8036_v63 = vadd.f32 %v5930_v15, %v5929_v53  ;;  %v8038_v18 = vadd.f32 %v5768_v17, %v5767_v14  ;;  %v8095_v15 = vld [vmem:[%s7431_s16 + $0x108] ss:$12 sps:$4 sm:$0xff]  }
 0x138   : > { %2542 = vmatmul.mubr.bf16.gmra.mrb[132].mxu0 %v8025_v2  ;;  %6525 = vmatmul.mubr.msk.bf16.gmra.mrb[24].mxu1 %vm670_vm0, %v7249_v47 }
 0x139   : > { %2549 = vmatprep.mubr.bf16.mxu0 %v8031_v56  ;;  %6528 = vmatprep.mubr.msk.bf16.mxu1 %vm670_vm0, %v7254_v11 }
 0x13b   : > { %v5932_v20 = vpop.f32.mrb[36].mxu1  ;;  %v5770_v22 = vpop.f32.mrb[28].mxu0 }
 0x13c   : > { %v5933_v1 = vpop.f32.mrb[37].mxu1  ;;  %v5771_v7 = vpop.f32.mrb[29].mxu0 }
 0x13d   : > { %v8048_v13 = vadd.f32 %v5933_v1, %v5932_v20  ;;  %v5935_v19 = vpop.f32.mrb[38].mxu1  ;;  %v8056_v27 = vadd.f32 %v5771_v7, %v5770_v22  ;;  %v5773_v24 = vpop.f32.mrb[30].mxu0 }
 0x13e   : > { %v5936_v26 = vpop.f32.mrb[39].mxu1  ;;  %v5774_v31 = vpop.f32.mrb[31].mxu0 }
 0x13f   : > { %v8058_v28 = vadd.f32 %v5936_v26, %v5935_v19  ;;  %v8060_v33 = vadd.f32 %v5774_v31, %v5773_v24  ;;  %v7304_v31 = vld [vmem:[%s8749_s1 + $0x318] sm:$0xff]  }
 0x140   : > { %2550 = vmatmul.mubr.bf16.gmra.mrb[136].mxu0 %v8045_v3  ;;  %6529 = vmatmul.mubr.msk.bf16.gmra.mrb[28].mxu1 %vm670_vm0, %v7256_v23  ;;  %v8102_v23 = vld [vmem:[%s7431_s16 + $0x124] ss:$12 sps:$4 sm:$0xff]  }
 0x141   : > { %2557 = vmatprep.mubr.bf16.mxu0 %v8051_v21  ;;  %4235 = vmatprep.mubr.bf16.mxu1 %v8054_v25 }
 0x143   : > { %v5938_v30 = vpop.f32.mrb[40].mxu1  ;;  %v5776_v39 = vpop.f32.mrb[32].mxu0 }
 0x144   : > { %v5939_v40 = vpop.f32.mrb[41].mxu1  ;;  %v5777_v45 = vpop.f32.mrb[33].mxu0 }
 0x145   : > { %v8072_v48 = vadd.f32 %v5939_v40, %v5938_v30  ;;  %v5941_v52 = vpop.f32.mrb[42].mxu1  ;;  %v8077_v55 = vadd.f32 %v5777_v45, %v5776_v39  ;;  %v5779_v42 = vpop.f32.mrb[34].mxu0 }
 0x146   : > { %v5942_v58 = vpop.f32.mrb[43].mxu1  ;;  %v5780_v61 = vpop.f32.mrb[35].mxu0 }
 0x147   : > { %v8082_v0 = vadd.f32 %v5942_v58, %v5941_v52  ;;  %v8084_v47 = vadd.f32 %v5780_v61, %v5779_v42  ;;  %v8116_v52 = vld [vmem:[%s7431_s16 + $0x120] ss:$12 sps:$4 sm:$0xff]  }
 0x148   : > { %2558 = vmatmul.mubr.bf16.gmra.mrb[140].mxu0 %v8070_v44  ;;  %4236 = vmatmul.mubr.bf16.vlgmr.msra.gmra.mrb[52].mxu1 %v8067_v43 }
 0x149   : > { %6533 = vmatpush3.bf16.msra.mxu1 %v7986_v35  ;;  %2565 = vmatprep.mubr.bf16.mxu0 %v8075_v54 }
 0x14a   : > { %4243 = vmatprep.mubr.bf16.mxu1 %v7914_v8  ;;  %6534 = vmatprep.subr.bf16.mxu1 %v7284_v62 }
 0x14b   : > { %v5944_v53 = vpop.f32.mrb[44].mxu1  ;;  %v5782_v11 = vpop.f32.mrb[36].mxu0 }
 0x14c   : > { %v5945_v14 = vpop.f32.mrb[45].mxu1  ;;  %v5783_v17 = vpop.f32.mrb[37].mxu0 }
 0x14d   : > { %v8097_v20 = vadd.f32 %v5945_v14, %v5944_v53  ;;  %v5947_v22 = vpop.f32.mrb[46].mxu1  ;;  %v8099_v1 = vadd.f32 %v5783_v17, %v5782_v11  ;;  %v5785_v35 = vpop.f32.mrb[38].mxu0  ;;  %6535 = vmatpush3.bf16.msra.mxu1 %v7284_v62  ;;  %v8123_v53 = vld [vmem:[%s7431_s16 + $0x13c] ss:$12 sps:$4 sm:$0xff]  }
 0x14e   : > { %v5948_v7 = vpop.f32.mrb[47].mxu1  ;;  %v5786_v19 = vpop.f32.mrb[39].mxu0  ;;  %6536 = vmatprep.subr.bf16.mxu1 %v7303_v4 }
 0x14f   : > { %v8104_v24 = vadd.f32 %v5948_v7, %v5947_v22  ;;  %v8106_v26 = vadd.f32 %v5786_v19, %v5785_v35  ;;  %v8134_v7 = vld [vmem:[%s7431_s16 + $0x138] ss:$12 sps:$4 sm:$0xff]  }
 0x150   : > { %2566 = vmatmul.mubr.bf16.gmra.mrb[144].mxu0 %v8095_v15  ;;  %4244 = vmatmul.mubr.bf16.gmra.mrb[56].mxu1 %v7950_v6 }
 0x151   : > { %8752 = vst [vmem:[#allocation2_spill] sm:$0xff] %v8106_v26  ;;  %2573 = vmatprep.mubr.bf16.mxu0 %v8102_v23  ;;  %4251 = vmatprep.mubr.bf16.mxu1 %v7954_v10 }
 0x152   : > { %6537 = vmatpush3.bf16.msra.mxu1 %v7303_v4 }
 0x153   : > { %v5950_v30 = vpop.f32.mrb[48].mxu1  ;;  %v5788_v39 = vpop.f32.mrb[40].mxu0  ;;  %6538 = vmatprep.subr.bf16.mxu1 %v7304_v31 }
 0x154   : > { %v5951_v40 = vpop.f32.mrb[49].mxu1  ;;  %v5789_v45 = vpop.f32.mrb[41].mxu0 }
 0x155   : > { %v8118_v42 = vadd.f32 %v5951_v40, %v5950_v30  ;;  %v5953_v58 = vpop.f32.mrb[50].mxu1  ;;  %v8120_v61 = vadd.f32 %v5789_v45, %v5788_v39  ;;  %v5791_v62 = vpop.f32.mrb[42].mxu0  ;;  %v8142_v39 = vld [vmem:[%s8750_s2] ss:$0 sm:$0xff] }
 0x156   : > { %v5954_v11 = vpop.f32.mrb[51].mxu1  ;;  %v5792_v14 = vpop.f32.mrb[43].mxu0  ;;  %6539 = vmatpush3.bf16.msra.mxu1 %v7304_v31  ;;  %v8137_v31 = vld [vmem:[%s7431_s16 + $0x154] ss:$12 sps:$4 sm:$0xff]  }
 0x157   : > { %8753 = vst [vmem:[#allocation3_spill] sm:$0xff] %v8120_v61  ;;  %v8125_v4 = vadd.f32 %v5954_v11, %v5953_v58  ;;  %v8127_v17 = vadd.f32 %v5792_v14, %v5791_v62 }
 0x158   : > { %2574 = vmatmul.mubr.bf16.gmra.mrb[148].mxu0 %v8116_v52  ;;  %4252 = vmatmul.mubr.bf16.gmra.mrb[60].mxu1 %v7992_v37 }
 0x159   : > { %8754 = vst [vmem:[#allocation4_spill] sm:$0xff] %v8127_v17  ;;  %2581 = vmatprep.mubr.bf16.mxu0 %v8123_v53  ;;  %4259 = vmatprep.mubr.bf16.mxu1 %v7996_v41  ;;  %v8160_v17 = vld [vmem:[%s7431_s16 + $0x16c] ss:$12 sps:$4 sm:$0xff]  }
 0x15b   : > { %v5794_v22 = vpop.f32.mrb[44].mxu0 }
 0x15c   : > { %v5795_v35 = vpop.f32.mrb[45].mxu0 }
 0x15d   : > { %v5796_v19 = vadd.f32 %v5795_v35, %v5794_v22  ;;  %v5797_v30 = vpop.f32.mrb[46].mxu0 }
 0x15e   : > { %v5798_v40 = vpop.f32.mrb[47].mxu0 }
 0x15f   : > { %v6708_v45 = vadd.f32 %v5796_v19, %v8142_v39  ;;  %v5799_v58 = vadd.f32 %v5798_v40, %v5797_v30  ;;  %v8157_v19 = vld [vmem:[%s7431_s16 + $0x150] ss:$12 sps:$4 sm:$0xff]  }
 0x160   : > { %2582 = vmatmul.mubr.bf16.gmra.mrb[152].mxu0 %v8134_v7  ;;  %4260 = vmatmul.mubr.bf16.gmra.mrb[64].mxu1 %v8009_v50 }
 0x161   : > { %v6720_v62 = vadd.f32 %v5799_v58, %v8142_v39  ;;  %2589 = vmatprep.mubr.bf16.mxu0 %v8137_v31  ;;  %4267 = vmatprep.mubr.bf16.mxu1 %v8013_v34  ;;  %v8151_v11 = vadd.f32 %v6708_v45, %v8028_v5 }
 0x163   : > { %8755 = vst [vmem:[#allocation5_spill] sm:$0xff] %v8151_v11  ;;  %v5800_v14 = vpop.f32.mrb[48].mxu0  ;;  %v8154_v22 = vadd.f32 %v6720_v62, %v8036_v63 }
 0x164   : > { %v5801_v35 = vpop.f32.mrb[49].mxu0 }
 0x165   : > { %8756 = vst [vmem:[#allocation6_spill] sm:$0xff] %v8154_v22  ;;  %v5802_v30 = vadd.f32 %v5801_v35, %v5800_v14  ;;  %v5803_v40 = vpop.f32.mrb[50].mxu0  ;;  %v8175_v35 = vld [vmem:[%s7431_s16 + $0x168] ss:$12 sps:$4 sm:$0xff]  }
 0x166   : > { %v5804_v58 = vpop.f32.mrb[51].mxu0 }
 0x167   : > { %v6738_v61 = vadd.f32 %v5802_v30, %v8142_v39  ;;  %v5805_v26 = vadd.f32 %v5804_v58, %v5803_v40  ;;  %v8178_v58 = vld [vmem:[%s7431_s16 + $0x184] ss:$12 sps:$4 sm:$0xff]  }
 0x168   : > { %2590 = vmatmul.mubr.bf16.gmra.mrb[156].mxu0 %v8157_v19  ;;  %4268 = vmatmul.mubr.bf16.gmra.mrb[68].mxu1 %v8025_v2 }
 0x169   : > { %v6750_v5 = vadd.f32 %v5805_v26, %v8142_v39  ;;  %2597 = vmatprep.mubr.bf16.mxu0 %v8160_v17  ;;  %4275 = vmatprep.mubr.bf16.mxu1 %v8031_v56  ;;  %v8169_v63 = vadd.f32 %v6738_v61, %v8048_v13 }
 0x16b   : > { %8757 = vst [vmem:[#allocation7_spill] sm:$0xff] %v8169_v63  ;;  %v5806_v45 = vpop.f32.mrb[52].mxu0  ;;  %v8172_v62 = vadd.f32 %v6750_v5, %v8058_v28 }
 0x16c   : > { %v5807_v14 = vpop.f32.mrb[53].mxu0 }
 0x16d   : > { %8758 = vst [vmem:[#allocation8_spill] sm:$0xff] %v8172_v62  ;;  %v5808_v30 = vadd.f32 %v5807_v14, %v5806_v45  ;;  %v5809_v40 = vpop.f32.mrb[54].mxu0  ;;  %v8193_v14 = vld [vmem:[%s7431_s16 + $0x180] ss:$12 sps:$4 sm:$0xff]  }
 0x16e   : > { %v5810_v26 = vpop.f32.mrb[55].mxu0 }
 0x16f   : > { %v6732_v22 = vadd.f32 %v5808_v30, %v8142_v39  ;;  %v5811_v11 = vadd.f32 %v5810_v26, %v5809_v40  ;;  %v8196_v26 = vld [vmem:[%s7431_s16 + $0x19c] ss:$12 sps:$4 sm:$0xff]  }
 0x170   : > { %2598 = vmatmul.mubr.bf16.gmra.mrb[160].mxu0 %v8175_v35  ;;  %4276 = vmatmul.mubr.bf16.gmra.mrb[72].mxu1 %v8045_v3 }
 0x171   : > { %v6744_v13 = vadd.f32 %v5811_v11, %v8142_v39  ;;  %2605 = vmatprep.mubr.bf16.mxu0 %v8178_v58  ;;  %4283 = vmatprep.mubr.bf16.mxu1 %v8051_v21  ;;  %v8187_v28 = vadd.f32 %v6732_v22, %v8072_v48 }
 0x173   : > { %8759 = vst [vmem:[#allocation9_spill] sm:$0xff] %v8187_v28  ;;  %v5812_v61 = vpop.f32.mrb[56].mxu0  ;;  %v8190_v5 = vadd.f32 %v6744_v13, %v8082_v0 }
 0x174   : > { %v5813_v45 = vpop.f32.mrb[57].mxu0 }
 0x175   : > { %8760 = vst [vmem:[#allocation10_spill] sm:$0xff] %v8190_v5  ;;  %v5814_v30 = vadd.f32 %v5813_v45, %v5812_v61  ;;  %v5815_v40 = vpop.f32.mrb[58].mxu0  ;;  %v8211_v45 = vld [vmem:[%s7431_s16 + $0x198] ss:$12 sps:$4 sm:$0xff]  }
 0x176   : > { %v5816_v11 = vpop.f32.mrb[59].mxu0 }
 0x177   : > { %v6762_v62 = vadd.f32 %v5814_v30, %v8142_v39  ;;  %v5817_v63 = vadd.f32 %v5816_v11, %v5815_v40  ;;  %v7302_v11 = vld [vmem:[%s7431_s16 + $0x4c] ss:$12 sps:$4 sm:$0xff]  }
 0x178   : > { %2606 = vmatmul.mubr.bf16.gmra.mrb[164].mxu0 %v8193_v14  ;;  %4284 = vmatmul.mubr.bf16.gmra.mrb[76].mxu1 %v8070_v44 }
 0x179   : > { %v6774_v48 = vadd.f32 %v5817_v63, %v8142_v39  ;;  %2613 = vmatprep.mubr.bf16.mxu0 %v8196_v26  ;;  %4291 = vmatprep.mubr.bf16.mxu1 %v8075_v54  ;;  %v8205_v0 = vadd.f32 %v6762_v62, %v8097_v20 }
 0x17b   : > { %8761 = vst [vmem:[#allocation11_spill] sm:$0xff] %v8205_v0  ;;  %v5818_v22 = vpop.f32.mrb[60].mxu0  ;;  %v8208_v13 = vadd.f32 %v6774_v48, %v8104_v24 }
 0x17c   : > { %v5819_v61 = vpop.f32.mrb[61].mxu0 }
 0x17d   : > { %8762 = vst [vmem:[#allocation12_spill] sm:$0xff] %v8208_v13  ;;  %v5820_v30 = vadd.f32 %v5819_v61, %v5818_v22  ;;  %v5821_v40 = vpop.f32.mrb[62].mxu0  ;;  %v7300_v61 = vld [vmem:[%s7431_s16 + $0x48] ss:$12 sps:$4 sm:$0xff]  }
 0x17e   : > { %v5822_v5 = vpop.f32.mrb[63].mxu0 }
 0x17f   : > { %v6756_v63 = vadd.f32 %v5820_v30, %v8142_v39  ;;  %v5823_v28 = vadd.f32 %v5822_v5, %v5821_v40  ;;  %v6594_v5 = vadd.f32 %v7851_v32, %v8142_v39 }
 0x180   : > { %2614 = vmatmul.mubr.bf16.gmra.mrb[168].mxu0 %v8211_v45  ;;  %4292 = vmatmul.mubr.bf16.gmra.mrb[80].mxu1 %v8095_v15 }
 0x181   : > { %v6768_v20 = vadd.f32 %v5823_v28, %v8142_v39  ;;  %3364 = vmatprep.mubr.bf16.mxu0 %v7302_v11  ;;  %4299 = vmatprep.mubr.bf16.mxu1 %v8102_v23  ;;  %v8220_v24 = vadd.f32 %v6756_v63, %v8118_v42  ;;  %v6606_v28 = vadd.f32 %v7857_v38, %v8142_v39 }
 0x182   : > { %v6588_v63 = vadd.f32 %v7880_v51, %v8142_v39 }
 0x183   : > { %v5860_v62 = vpop.f32.mrb[64].mxu0  ;;  %v8223_v48 = vadd.f32 %v6768_v20, %v8125_v4 }
 0x184   : > { %v5861_v22 = vpop.f32.mrb[65].mxu0 }
 0x185   : > { %v5862_v30 = vadd.f32 %v5861_v22, %v5860_v62  ;;  %v5863_v40 = vpop.f32.mrb[66].mxu0 }
 0x186   : > { %v5864_v13 = vpop.f32.mrb[67].mxu0 }
 0x187   : > { %v8230_v11 = vadd.f32 %v6594_v5, %v5862_v30  ;;  %v5865_v0 = vadd.f32 %v5864_v13, %v5863_v40  ;;  %v6600_v13 = vadd.f32 %v7891_v36, %v8142_v39  ;;  %v6618_v5 = vadd.f32 %v7917_v9, %v8142_v39 }
 0x188   : > { %3365 = vmatmul.mubr.bf16.vlgmr.msra.gmra.mrb[172].mxu0 %v7300_v61  ;;  %4300 = vmatmul.mubr.bf16.gmra.mrb[84].mxu1 %v8116_v52 }
 0x189   : > { %v8233_v42 = vadd.f32 %v6606_v28, %v5865_v0  ;;  %3372 = vmatprep.mubr.bf16.mxu0 %v8054_v25  ;;  %4307 = vmatprep.mubr.bf16.mxu1 %v8123_v53  ;;  %v6630_v28 = vadd.f32 %v7925_v60, %v8142_v39 }
 0x18b   : > { %v5866_v4 = vpop.f32.mrb[68].mxu0 }
 0x18c   : > { %v5867_v32 = vpop.f32.mrb[69].mxu0 }
 0x18d   : > { %v5868_v20 = vadd.f32 %v5867_v32, %v5866_v4  ;;  %v5869_v62 = vpop.f32.mrb[70].mxu0 }
 0x18e   : > { %v5870_v38 = vpop.f32.mrb[71].mxu0 }
 0x18f   : > { %v8241_v22 = vadd.f32 %v6588_v63, %v5868_v20  ;;  %v5871_v61 = vadd.f32 %v5870_v38, %v5869_v62  ;;  %v6612_v63 = vadd.f32 %v7957_v16, %v8142_v39  ;;  %v6624_v38 = vadd.f32 %v7965_v29, %v8142_v39 }
 0x190   : > { %3373 = vmatmul.mubr.bf16.gmra.mrb[176].mxu0 %v8067_v43  ;;  %4308 = vmatmul.mubr.bf16.gmra.mrb[88].mxu1 %v8134_v7 }
 0x191   : > { %v8245_v25 = vadd.f32 %v6600_v13, %v5871_v61  ;;  %3380 = vmatprep.mubr.bf16.mxu0 %v7914_v8  ;;  %4315 = vmatprep.mubr.bf16.mxu1 %v8137_v31 }
 0x193   : > { %v5872_v51 = vpop.f32.mrb[72].mxu0 }
 0x194   : > { %v5873_v0 = vpop.f32.mrb[73].mxu0 }
 0x195   : > { %v5874_v30 = vadd.f32 %v5873_v0, %v5872_v51  ;;  %v5875_v36 = vpop.f32.mrb[74].mxu0  ;;  %v6642_v51 = vadd.f32 %v7999_v49, %v8142_v39 }
 0x196   : > { %v5876_v40 = vpop.f32.mrb[75].mxu0 }
 0x197   : > { %v8253_v43 = vadd.f32 %v6618_v5, %v5874_v30  ;;  %v5877_v4 = vadd.f32 %v5876_v40, %v5875_v36 }
 0x198   : > { %3381 = vmatmul.mubr.bf16.gmra.mrb[180].mxu0 %v7950_v6  ;;  %4316 = vmatmul.mubr.bf16.gmra.mrb[92].mxu1 %v8157_v19 }
 0x199   : > { %v8257_v8 = vadd.f32 %v6630_v28, %v5877_v4  ;;  %3388 = vmatprep.mubr.bf16.mxu0 %v7954_v10  ;;  %4323 = vmatprep.mubr.bf16.mxu1 %v8160_v17  ;;  %v6636_v28 = vadd.f32 %v8016_v57, %v8142_v39 }
 0x19b   : > { %v5878_v9 = vpop.f32.mrb[76].mxu0 }
 0x19c   : > { %v5879_v32 = vpop.f32.mrb[77].mxu0 }
 0x19d   : > { %v5880_v20 = vadd.f32 %v5879_v32, %v5878_v9  ;;  %v5881_v60 = vpop.f32.mrb[78].mxu0  ;;  %v8288_v9 = vld [vmem:[%s7431_s16 + $0x1b4] ss:$12 sps:$4 sm:$0xff]   ;;  %v6648_v32 = vadd.f32 %v8018_v59, %v8142_v39  ;;  %v6666_v59 = vadd.f32 %v8034_v12, %v8142_v39 }
 0x19e   : > { %v5882_v62 = vpop.f32.mrb[79].mxu0 }
 0x19f   : > { %v8265_v6 = vadd.f32 %v6612_v63, %v5880_v20  ;;  %v5883_v13 = vadd.f32 %v5882_v62, %v5881_v60  ;;  %v8301_v62 = vld [vmem:[%s7431_s16 + $0x1b0] ss:$12 sps:$4 sm:$0xff]  }
 0x1a0   : > { %3389 = vmatmul.mubr.bf16.gmra.mrb[184].mxu0 %v7992_v37  ;;  %4324 = vmatmul.mubr.bf16.gmra.mrb[96].mxu1 %v8175_v35  ;;  %v6654_v37 = vadd.f32 %v8001_v46, %v8142_v39 }
 0x1a1   : > { %v8269_v10 = vadd.f32 %v6624_v38, %v5883_v13  ;;  %3396 = vmatprep.mubr.bf16.mxu0 %v7996_v41  ;;  %4331 = vmatprep.mubr.bf16.mxu1 %v8178_v58 }
 0x1a3   : > { %v5884_v16 = vpop.f32.mrb[80].mxu0 }
 0x1a4   : > { %v5885_v61 = vpop.f32.mrb[81].mxu0 }
 0x1a5   : > { %v5886_v0 = vadd.f32 %v5885_v61, %v5884_v16  ;;  %v5887_v29 = vpop.f32.mrb[82].mxu0  ;;  %v7308_v16 = vld [vmem:[%s7431_s16 + $0x1cc] ss:$12 sps:$4 sm:$0xff]   ;;  %v6678_v61 = vadd.f32 %v8038_v18, %v8142_v39 }
 0x1a6   : > { %v5888_v5 = vpop.f32.mrb[83].mxu0 }
 0x1a7   : > { %v8277_v30 = vadd.f32 %v6642_v51, %v5886_v0  ;;  %v5889_v36 = vadd.f32 %v5888_v5, %v5887_v29  ;;  %v7310_v5 = vld [vmem:[%s7431_s16 + $0x1c8] ss:$12 sps:$4 sm:$0xff]  }
 0x1a8   : > { %3397 = vmatmul.mubr.bf16.gmra.mrb[188].mxu0 %v8009_v50  ;;  %4332 = vmatmul.mubr.bf16.gmra.mrb[100].mxu1 %v8193_v14 }
 0x1a9   : > { %v8281_v41 = vadd.f32 %v6654_v37, %v5889_v36  ;;  %3404 = vmatprep.mubr.bf16.mxu0 %v8013_v34  ;;  %4339 = vmatprep.mubr.bf16.mxu1 %v8196_v26  ;;  %v6660_v37 = vadd.f32 %v8056_v27, %v8142_v39 }
 0x1ab   : > { %v5890_v49 = vpop.f32.mrb[84].mxu0 }
 0x1ac   : > { %v5891_v40 = vpop.f32.mrb[85].mxu0 }
 0x1ad   : > { %v5892_v46 = vadd.f32 %v5891_v40, %v5890_v49  ;;  %v5893_v4 = vpop.f32.mrb[86].mxu0  ;;  %v7311_v49 = vld [vmem:[%s7431_s16 + $0x68] ss:$12 sps:$4 sm:$0xff]  }
 0x1ae   : > { %v5894_v50 = vpop.f32.mrb[87].mxu0 }
 0x1af   : > { %v8292_v63 = vadd.f32 %v6636_v28, %v5892_v46  ;;  %v5895_v34 = vadd.f32 %v5894_v50, %v5893_v4  ;;  %v7312_v50 = vld [vmem:[%s7431_s16 + $0x80] ss:$12 sps:$4 sm:$0xff]  }
 0x1b0   : > { %3405 = vmatmul.mubr.bf16.gmra.mrb[192].mxu0 %v8025_v2  ;;  %4340 = vmatmul.mubr.bf16.gmra.mrb[104].mxu1 %v8211_v45 }
 0x1b1   : > { %v8296_v20 = vadd.f32 %v6648_v32, %v5895_v34  ;;  %3412 = vmatprep.mubr.bf16.mxu0 %v8031_v56  ;;  %4347 = vmatprep.mubr.bf16.mxu1 %v8288_v9  ;;  %v6690_v32 = vadd.f32 %v8077_v55, %v8142_v39 }
 0x1b3   : > { %v5896_v57 = vpop.f32.mrb[88].mxu0 }
 0x1b4   : > { %v5897_v60 = vpop.f32.mrb[89].mxu0 }
 0x1b5   : > { %v5898_v38 = vadd.f32 %v5897_v60, %v5896_v57  ;;  %v5899_v13 = vpop.f32.mrb[90].mxu0  ;;  %v7313_v57 = vld [vmem:[%s7431_s16 + $0x98] ss:$12 sps:$4 sm:$0xff]  }
 0x1b6   : > { %v5900_v2 = vpop.f32.mrb[91].mxu0 }
 0x1b7   : > { %v8308_v51 = vadd.f32 %v6666_v59, %v5898_v38  ;;  %v5901_v56 = vadd.f32 %v5900_v2, %v5899_v13 }
 0x1b8   : > { %3413 = vmatmul.mubr.bf16.gmra.mrb[196].mxu0 %v8045_v3  ;;  %4348 = vmatmul.mubr.bf16.gmra.mrb[108].mxu1 %v8301_v62  ;;  %v6672_v3 = vadd.f32 %v8060_v33, %v8142_v39 }
 0x1b9   : > { %v8312_v0 = vadd.f32 %v6678_v61, %v5901_v56  ;;  %3420 = vmatprep.mubr.bf16.mxu0 %v8051_v21  ;;  %4355 = vmatprep.mubr.bf16.mxu1 %v7308_v16  ;;  %v7314_v16 = vld [vmem:[%s7431_s16 + $0xb0] ss:$12 sps:$4 sm:$0xff]   ;;  %v7315_v56 = vld [vmem:[%s7431_s16 + $0xc8] ss:$12 sps:$4 sm:$0xff]  }
 0x1bb   : > { %v5902_v12 = vpop.f32.mrb[92].mxu0 }
 0x1bc   : > { %v5903_v29 = vpop.f32.mrb[93].mxu0 }
 0x1bd   : > { %v5904_v18 = vadd.f32 %v5903_v29, %v5902_v12  ;;  %v5905_v36 = vpop.f32.mrb[94].mxu0  ;;  %v8763_v12 = vld [vmem:[#allocation2_spill] sm:$0xff] }
 0x1be   : > { %v5906_v40 = vpop.f32.mrb[95].mxu0  ;;  %v6696_v29 = vadd.f32 %v8763_v12, %v8142_v39 }
 0x1bf   : > { %v8321_v28 = vadd.f32 %v6660_v37, %v5904_v18  ;;  %v5907_v46 = vadd.f32 %v5906_v40, %v5905_v36  ;;  %v7316_v36 = vld [vmem:[%s7431_s16 + $0xe0] ss:$12 sps:$4 sm:$0xff]  }
 0x1c0   : > { %3421 = vmatmul.mubr.bf16.gmra.mrb[200].mxu0 %v8070_v44  ;;  %4356 = vmatmul.mubr.bf16.gmra.mrb[112].mxu1 %v7310_v5  ;;  %v6702_v44 = vadd.f32 %v8084_v47, %v8142_v39  ;;  %v6684_v47 = vadd.f32 %v8099_v1, %v8142_v39 }
 0x1c1   : > { %v8324_v21 = vadd.f32 %v6672_v3, %v5907_v46  ;;  %3428 = vmatprep.mubr.bf16.mxu0 %v8075_v54  ;;  %6540 = vmatprep.mubr.msk.bf16.mxu1 %vm670_vm0, %v7311_v49  ;;  %v8764_v49 = vld [vmem:[#allocation3_spill] sm:$0xff] }
 0x1c2   : > { %v6714_v40 = vadd.f32 %v8764_v49, %v8142_v39 }
 0x1c3   : > { %v5908_v27 = vpop.f32.mrb[96].mxu0 }
 0x1c4   : > { %v5909_v4 = vpop.f32.mrb[97].mxu0 }
 0x1c5   : > { %v5910_v33 = vadd.f32 %v5909_v4, %v5908_v27  ;;  %v5911_v34 = vpop.f32.mrb[98].mxu0  ;;  %v7317_v27 = vld [vmem:[%s7431_s16 + $0xf8] ss:$12 sps:$4 sm:$0xff]   ;;  %v8765_v4 = vld [vmem:[#allocation4_spill] sm:$0xff] }
 0x1c6   : > { %v5912_v60 = vpop.f32.mrb[99].mxu0 }
 0x1c7   : > { %v8334_v59 = vadd.f32 %v6690_v32, %v5910_v33  ;;  %v5913_v54 = vadd.f32 %v5912_v60, %v5911_v34  ;;  %v7318_v60 = vld [vmem:[%s7431_s16 + $0x110] ss:$12 sps:$4 sm:$0xff]  }
 0x1c8   : > { %3429 = vmatmul.mubr.bf16.gmra.mrb[204].mxu0 %v8095_v15  ;;  %6541 = vmatmul.mubr.msk.bf16.vlgmr.msra.gmra.mrb[0].mxu1 %vm670_vm0, %v7312_v50  ;;  %v6726_v50 = vadd.f32 %v8765_v4, %v8142_v39 }
 0x1c9   : > { %v8338_v38 = vadd.f32 %v6702_v44, %v5913_v54  ;;  %3436 = vmatprep.mubr.bf16.mxu0 %v8102_v23  ;;  %6544 = vmatprep.mubr.msk.bf16.mxu1 %vm670_vm0, %v7313_v57  ;;  %v7319_v54 = vld [vmem:[%s7431_s16 + $0x128] ss:$12 sps:$4 sm:$0xff]  }
 0x1cb   : > { %v5914_v55 = vpop.f32.mrb[100].mxu0 }
 0x1cc   : > { %v5915_v13 = vpop.f32.mrb[101].mxu0 }
 0x1cd   : > { %v5916_v2 = vadd.f32 %v5915_v13, %v5914_v55  ;;  %v5917_v61 = vpop.f32.mrb[102].mxu0 }
 0x1ce   : > { %v5918_v15 = vpop.f32.mrb[103].mxu0 }
 0x1cf   : > { %v8348_v5 = vadd.f32 %v6684_v47, %v5916_v2  ;;  %v5919_v23 = vadd.f32 %v5918_v15, %v5917_v61  ;;  %v7320_v2 = vld [vmem:[%s7431_s16 + $0x140] ss:$12 sps:$4 sm:$0xff]  }
 0x1d0   : > { %3437 = vmatmul.mubr.bf16.gmra.mrb[208].mxu0 %v8116_v52  ;;  %6545 = vmatmul.mubr.msk.bf16.gmra.mrb[4].mxu1 %vm670_vm0, %v7314_v16 }
 0x1d1   : > { %v8352_v37 = vadd.f32 %v6696_v29, %v5919_v23  ;;  %3444 = vmatprep.mubr.bf16.mxu0 %v8123_v53  ;;  %6548 = vmatprep.mubr.msk.bf16.mxu1 %vm670_vm0, %v7315_v56  ;;  %v7321_v56 = vld [vmem:[%s7431_s16 + $0x158] ss:$12 sps:$4 sm:$0xff]   ;;  %v7322_v23 = vld [vmem:[%s7431_s16 + $0x170] ss:$12 sps:$4 sm:$0xff]  }
 0x1d3   : > { %v5920_v1 = vpop.f32.mrb[104].mxu0 }
 0x1d4   : > { %v5921_v18 = vpop.f32.mrb[105].mxu0 }
 0x1d5   : > { %v5922_v3 = vadd.f32 %v5921_v18, %v5920_v1  ;;  %v5923_v46 = vpop.f32.mrb[106].mxu0  ;;  %v7323_v18 = vld [vmem:[%s7431_s16 + $0x188] ss:$12 sps:$4 sm:$0xff]  }
 0x1d6   : > { %v5924_v52 = vpop.f32.mrb[107].mxu0 }
 0x1d7   : > { %v8362_v32 = vadd.f32 %v6714_v40, %v5922_v3  ;;  %v5925_v53 = vadd.f32 %v5924_v52, %v5923_v46  ;;  %v7324_v3 = vld [vmem:[%s7431_s16 + $0x1a0] ss:$12 sps:$4 sm:$0xff]  }
 0x1d8   : > { %3445 = vmatmul.mubr.bf16.gmra.mrb[212].mxu0 %v8134_v7  ;;  %6549 = vmatmul.mubr.msk.bf16.gmra.mrb[8].mxu1 %vm670_vm0, %v7316_v36 }
 0x1d9   : > { %v8366_v33 = vadd.f32 %v6726_v50, %v5925_v53  ;;  %3452 = vmatprep.mubr.bf16.mxu0 %v8137_v31  ;;  %6552 = vmatprep.mubr.msk.bf16.mxu1 %vm670_vm0, %v7317_v27  ;;  %v7326_v53 = vld [vmem:[%s7431_s16 + $0x1d0] ss:$12 sps:$4 sm:$0xff]  }
 0x1db   : > { %v5992_v34 = vpop.f32.mrb[108].mxu0 }
 0x1dc   : > { %v5993_v57 = vpop.f32.mrb[109].mxu0 }
 0x1dd   : > { %v5994_v44 = vadd.f32 %v5993_v57, %v5992_v34  ;;  %v5995_v39 = vpop.f32.mrb[110].mxu0 }
 0x1de   : > { %v5996_v55 = vpop.f32.mrb[111].mxu0 }
 0x1df   : > { %v8373_v13 = vadd.f32 %v8230_v11, %v5994_v44  ;;  %v5997_v7 = vadd.f32 %v5996_v55, %v5995_v39 }
 0x1e0   : > { %3453 = vmatmul.mubr.bf16.gmra.mrb[216].mxu0 %v8157_v19  ;;  %6553 = vmatmul.mubr.msk.bf16.gmra.mrb[12].mxu1 %vm670_vm0, %v7318_v60 }
 0x1e1   : > { %v8378_v31 = vadd.f32 %v8233_v42, %v5997_v7  ;;  %3460 = vmatprep.mubr.bf16.mxu0 %v8160_v17  ;;  %6556 = vmatprep.mubr.msk.bf16.mxu1 %vm670_vm0, %v7319_v54 }
 0x1e3   : > { %v5998_v16 = vpop.f32.mrb[112].mxu0 }
 0x1e4   : > { %v5999_v47 = vpop.f32.mrb[113].mxu0 }
 0x1e5   : > { %v6000_v61 = vadd.f32 %v5999_v47, %v5998_v16  ;;  %v6001_v11 = vpop.f32.mrb[114].mxu0 }
 0x1e6   : > { %v6002_v15 = vpop.f32.mrb[115].mxu0 }
 0x1e7   : > { %v8385_v19 = vadd.f32 %v8241_v22, %v6000_v61  ;;  %v6003_v12 = vadd.f32 %v6002_v15, %v6001_v11 }
 0x1e8   : > { %3461 = vmatmul.mubr.bf16.gmra.mrb[220].mxu0 %v8175_v35  ;;  %6557 = vmatmul.mubr.msk.bf16.gmra.mrb[16].mxu1 %vm670_vm0, %v7320_v2 }
 0x1e9   : > { %v8390_v17 = vadd.f32 %v8245_v25, %v6003_v12  ;;  %3468 = vmatprep.mubr.bf16.mxu0 %v8178_v58  ;;  %6560 = vmatprep.mubr.msk.bf16.mxu1 %vm670_vm0, %v7321_v56 }
 0x1eb   : > { %v6004_v42 = vpop.f32.mrb[116].mxu0 }
 0x1ec   : > { %v6005_v29 = vpop.f32.mrb[117].mxu0 }
 0x1ed   : > { %v6006_v1 = vadd.f32 %v6005_v29, %v6004_v42  ;;  %v6007_v22 = vpop.f32.mrb[118].mxu0 }
 0x1ee   : > { %v6008_v36 = vpop.f32.mrb[119].mxu0 }
 0x1ef   : > { %v8397_v35 = vadd.f32 %v8253_v43, %v6006_v1  ;;  %v6009_v49 = vadd.f32 %v6008_v36, %v6007_v22  ;;  %v7325_v43 = vld [vmem:[%s7431_s16 + $0x1b8] ss:$12 sps:$4 sm:$0xff]   ;;  %s5695_s16 = sshll.u32 %s8785_s12, 7 }
 0x1f0   : > { %3469 = vmatmul.mubr.bf16.gmra.mrb[224].mxu0 %v8193_v14  ;;  %6561 = vmatmul.mubr.msk.bf16.gmra.mrb[20].mxu1 %vm670_vm0, %v7322_v23  ;;  %s8721_s25 = scalar_lea.vmem %s8751_s3, %s5695_s16 }
 0x1f1   : > { %v8402_v58 = vadd.f32 %v8257_v8, %v6009_v49  ;;  %3476 = vmatprep.mubr.bf16.mxu0 %v8196_v26  ;;  %6564 = vmatprep.mubr.msk.bf16.mxu1 %vm670_vm0, %v7323_v18 }
 0x1f3   : > { %v6010_v25 = vpop.f32.mrb[120].mxu0 }
 0x1f4   : > { %v6011_v40 = vpop.f32.mrb[121].mxu0 }
 0x1f5   : > { %v6012_v46 = vadd.f32 %v6011_v40, %v6010_v25  ;;  %v6013_v27 = vpop.f32.mrb[122].mxu0 }
 0x1f6   : > { %v6014_v52 = vpop.f32.mrb[123].mxu0 }
 0x1f7   : > { %v8409_v4 = vadd.f32 %v8265_v6, %v6012_v46  ;;  %v6015_v14 = vadd.f32 %v6014_v52, %v6013_v27 }
 0x1f8   : > { %3477 = vmatmul.mubr.bf16.gmra.mrb[228].mxu0 %v8211_v45  ;;  %6565 = vmatmul.mubr.msk.bf16.gmra.mrb[24].mxu1 %vm670_vm0, %v7324_v3 }
 0x1f9   : > { %v8414_v26 = vadd.f32 %v8269_v10, %v6015_v14  ;;  %3484 = vmatprep.mubr.bf16.mxu0 %v8288_v9  ;;  %6568 = vmatprep.mubr.msk.bf16.mxu1 %vm670_vm0, %v7325_v43 }
 0x1fb   : > { %v6016_v8 = vpop.f32.mrb[124].mxu0 }
 0x1fc   : > { %v6017_v50 = vpop.f32.mrb[125].mxu0 }
 0x1fd   : > { %v6018_v34 = vadd.f32 %v6017_v50, %v6016_v8  ;;  %v6019_v57 = vpop.f32.mrb[126].mxu0 }
 0x1fe   : > { %v6020_v60 = vpop.f32.mrb[127].mxu0 }
 0x1ff   : > { %v8420_v6 = vadd.f32 %v8277_v30, %v6018_v34  ;;  %v6021_v44 = vadd.f32 %v6020_v60, %v6019_v57 }
 0x200   : > { %3485 = vmatmul.mubr.bf16.gmra.mrb[232].mxu0 %v8301_v62  ;;  %6569 = vmatmul.mubr.msk.bf16.gmra.mrb[28].mxu1 %vm670_vm0, %v7326_v53 }
 0x201   : > { %v8425_v45 = vadd.f32 %v8281_v41, %v6021_v44 }
 0x203   : > { %v6022_v10 = vpop.f32.mrb[128].mxu0 }
 0x204   : > { %v6023_v9 = vpop.f32.mrb[129].mxu0 }
 0x205   : > { %v6024_v39 = vadd.f32 %v6023_v9, %v6022_v10  ;;  %v6025_v54 = vpop.f32.mrb[130].mxu0 }
 0x206   : > { %v6026_v55 = vpop.f32.mrb[131].mxu0 }
 0x207   : > { %v8428_v7 = vadd.f32 %v8292_v63, %v6024_v39  ;;  %v6027_v16 = vadd.f32 %v6026_v55, %v6025_v54 }
 0x209   : > { %v8431_v30 = vadd.f32 %v8296_v20, %v6027_v16 }
 0x20b   : > { %v6028_v47 = vpop.f32.mrb[132].mxu0 }
 0x20c   : > { %v6029_v2 = vpop.f32.mrb[133].mxu0 }
 0x20d   : > { %v6030_v62 = vadd.f32 %v6029_v2, %v6028_v47  ;;  %v6031_v61 = vpop.f32.mrb[134].mxu0 }
 0x20e   : > { %v6032_v11 = vpop.f32.mrb[135].mxu0 }
 0x20f   : > { %v8434_v41 = vadd.f32 %v8308_v51, %v6030_v62  ;;  %v6033_v56 = vadd.f32 %v6032_v11, %v6031_v61 }
 0x211   : > { %v8437_v15 = vadd.f32 %v8312_v0, %v6033_v56 }
 0x213   : > { %v6034_v12 = vpop.f32.mrb[136].mxu0 }
 0x214   : > { %v6035_v42 = vpop.f32.mrb[137].mxu0 }
 0x215   : > { %v6036_v63 = vadd.f32 %v6035_v42, %v6034_v12  ;;  %v6037_v29 = vpop.f32.mrb[138].mxu0 }
 0x216   : > { %v6038_v23 = vpop.f32.mrb[139].mxu0 }
 0x217   : > { %v8440_v20 = vadd.f32 %v8321_v28, %v6036_v63  ;;  %v6039_v1 = vadd.f32 %v6038_v23, %v6037_v29 }
 0x219   : > { %v8443_v22 = vadd.f32 %v8324_v21, %v6039_v1 }
 0x21b   : > { %v6040_v18 = vpop.f32.mrb[140].mxu0  ;;  %v6256_v36 = vpop.f32.mrb[52].mxu1 }
 0x21c   : > { %v6041_v51 = vpop.f32.mrb[141].mxu0  ;;  %v6257_v49 = vpop.f32.mrb[53].mxu1 }
 0x21d   : > { %v6042_v25 = vadd.f32 %v6041_v51, %v6040_v18  ;;  %v8445_v40 = vadd.f32 %v6257_v49, %v6256_v36  ;;  %v6043_v0 = vpop.f32.mrb[142].mxu0  ;;  %v6259_v3 = vpop.f32.mrb[54].mxu1 }
 0x21e   : > { %v6044_v46 = vpop.f32.mrb[143].mxu0  ;;  %v6260_v27 = vpop.f32.mrb[55].mxu1 }
 0x21f   : > { %v8448_v43 = vadd.f32 %v8334_v59, %v6042_v25  ;;  %v6045_v28 = vadd.f32 %v6044_v46, %v6043_v0  ;;  %v8450_v52 = vadd.f32 %v6260_v27, %v6259_v3  ;;  %v8766_v27 = vld [vmem:[#allocation5_spill] sm:$0xff] }
 0x221   : > { %v8453_v21 = vadd.f32 %v8338_v38, %v6045_v28 }
 0x223   : > { %v6046_v14 = vpop.f32.mrb[144].mxu0  ;;  %v6262_v8 = vpop.f32.mrb[56].mxu1 }
 0x224   : > { %v6047_v50 = vpop.f32.mrb[145].mxu0  ;;  %v6263_v53 = vpop.f32.mrb[57].mxu1 }
 0x225   : > { %v6048_v34 = vadd.f32 %v6047_v50, %v6046_v14  ;;  %v8455_v57 = vadd.f32 %v6263_v53, %v6262_v8  ;;  %v6049_v60 = vpop.f32.mrb[146].mxu0  ;;  %v6265_v44 = vpop.f32.mrb[58].mxu1  ;;  %v8767_v8 = vld [vmem:[#allocation6_spill] sm:$0xff] }
 0x226   : > { %v6050_v10 = vpop.f32.mrb[147].mxu0  ;;  %v6266_v9 = vpop.f32.mrb[59].mxu1 }
 0x227   : > { %v8458_v59 = vadd.f32 %v8348_v5, %v6048_v34  ;;  %v6051_v39 = vadd.f32 %v6050_v10, %v6049_v60  ;;  %v8460_v54 = vadd.f32 %v6266_v9, %v6265_v44 }
 0x229   : > { %v8463_v38 = vadd.f32 %v8352_v37, %v6051_v39 }
 0x22b   : > { %v6052_v55 = vpop.f32.mrb[148].mxu0  ;;  %v6268_v16 = vpop.f32.mrb[60].mxu1 }
 0x22c   : > { %v6053_v47 = vpop.f32.mrb[149].mxu0  ;;  %v6269_v2 = vpop.f32.mrb[61].mxu1 }
 0x22d   : > { %v6054_v62 = vadd.f32 %v6053_v47, %v6052_v55  ;;  %v8465_v61 = vadd.f32 %v6269_v2, %v6268_v16  ;;  %v6055_v11 = vpop.f32.mrb[150].mxu0  ;;  %v6271_v56 = vpop.f32.mrb[62].mxu1  ;;  %v8768_v47 = vld [vmem:[#allocation7_spill] sm:$0xff] }
 0x22e   : > { %v6056_v12 = vpop.f32.mrb[151].mxu0  ;;  %v6272_v42 = vpop.f32.mrb[63].mxu1 }
 0x22f   : > { %v8468_v5 = vadd.f32 %v8362_v32, %v6054_v62  ;;  %v6057_v63 = vadd.f32 %v6056_v12, %v6055_v11  ;;  %v8470_v29 = vadd.f32 %v6272_v42, %v6271_v56  ;;  %v8769_v56 = vld [vmem:[#allocation8_spill] sm:$0xff] }
 0x231   : > { %v8473_v37 = vadd.f32 %v8366_v33, %v6057_v63 }
 0x233   : > { %v6058_v23 = vpop.f32.mrb[152].mxu0  ;;  %v6274_v1 = vpop.f32.mrb[64].mxu1 }
 0x234   : > { %v6059_v18 = vpop.f32.mrb[153].mxu0  ;;  %v6275_v36 = vpop.f32.mrb[65].mxu1 }
 0x235   : > { %v6060_v51 = vadd.f32 %v6059_v18, %v6058_v23  ;;  %v8475_v49 = vadd.f32 %v6275_v36, %v6274_v1  ;;  %v6061_v25 = vpop.f32.mrb[154].mxu0  ;;  %v6277_v0 = vpop.f32.mrb[66].mxu1 }
 0x236   : > { %v6062_v3 = vpop.f32.mrb[155].mxu0  ;;  %v6278_v46 = vpop.f32.mrb[67].mxu1 }
 0x237   : > { %v8478_v32 = vadd.f32 %v8766_v27, %v6060_v51  ;;  %v6063_v28 = vadd.f32 %v6062_v3, %v6061_v25  ;;  %v8480_v14 = vadd.f32 %v6278_v46, %v6277_v0  ;;  %v8770_v46 = vld [vmem:[#allocation9_spill] sm:$0xff] }
 0x239   : > { %v8483_v33 = vadd.f32 %v8767_v8, %v6063_v28 }
 0x23b   : > { %v6064_v50 = vpop.f32.mrb[156].mxu0  ;;  %v6280_v53 = vpop.f32.mrb[68].mxu1 }
 0x23c   : > { %v6065_v34 = vpop.f32.mrb[157].mxu0  ;;  %v6281_v60 = vpop.f32.mrb[69].mxu1 }
 0x23d   : > { %v6066_v44 = vadd.f32 %v6065_v34, %v6064_v50  ;;  %v8485_v10 = vadd.f32 %v6281_v60, %v6280_v53  ;;  %v6067_v9 = vpop.f32.mrb[158].mxu0  ;;  %v6283_v39 = vpop.f32.mrb[70].mxu1  ;;  %v8771_v50 = vld [vmem:[#allocation10_spill] sm:$0xff] }
 0x23e   : > { %v6068_v55 = vpop.f32.mrb[159].mxu0  ;;  %v6284_v16 = vpop.f32.mrb[71].mxu1 }
 0x23f   : > { %v8488_v2 = vadd.f32 %v8768_v47, %v6066_v44  ;;  %v6069_v62 = vadd.f32 %v6068_v55, %v6067_v9  ;;  %v8490_v11 = vadd.f32 %v6284_v16, %v6283_v39 }
 0x241   : > { %v8493_v12 = vadd.f32 %v8769_v56, %v6069_v62 }
 0x243   : > { %v6070_v42 = vpop.f32.mrb[160].mxu0  ;;  %v6286_v63 = vpop.f32.mrb[72].mxu1 }
 0x244   : > { %v6071_v23 = vpop.f32.mrb[161].mxu0  ;;  %v6287_v1 = vpop.f32.mrb[73].mxu1 }
 0x245   : > { %v6072_v18 = vadd.f32 %v6071_v23, %v6070_v42  ;;  %v8495_v36 = vadd.f32 %v6287_v1, %v6286_v63  ;;  %v6073_v51 = vpop.f32.mrb[162].mxu0  ;;  %v6289_v25 = vpop.f32.mrb[74].mxu1  ;;  %v8772_v42 = vld [vmem:[#allocation11_spill] sm:$0xff] }
 0x246   : > { %v6074_v0 = vpop.f32.mrb[163].mxu0  ;;  %v6290_v3 = vpop.f32.mrb[75].mxu1 }
 0x247   : > { %v8498_v27 = vadd.f32 %v8770_v46, %v6072_v18  ;;  %v6075_v28 = vadd.f32 %v6074_v0, %v6073_v51  ;;  %v8500_v8 = vadd.f32 %v6290_v3, %v6289_v25  ;;  %v8774_v18 = vld [vmem:[#allocation12_spill] sm:$0xff] }
 0x249   : > { %v8503_v53 = vadd.f32 %v8771_v50, %v6075_v28 }
 0x24b   : > { %v6076_v34 = vpop.f32.mrb[164].mxu0  ;;  %v6292_v60 = vpop.f32.mrb[76].mxu1 }
 0x24c   : > { %v6077_v44 = vpop.f32.mrb[165].mxu0  ;;  %v6293_v9 = vpop.f32.mrb[77].mxu1 }
 0x24d   : > { %v6078_v39 = vadd.f32 %v6077_v44, %v6076_v34  ;;  %v8505_v55 = vadd.f32 %v6293_v9, %v6292_v60  ;;  %v6079_v16 = vpop.f32.mrb[166].mxu0  ;;  %v6295_v47 = vpop.f32.mrb[78].mxu1 }
 0x24e   : > { %v6080_v62 = vpop.f32.mrb[167].mxu0  ;;  %v6296_v56 = vpop.f32.mrb[79].mxu1 }
 0x24f   : > { %v8508_v63 = vadd.f32 %v8772_v42, %v6078_v39  ;;  %v6081_v23 = vadd.f32 %v6080_v62, %v6079_v16  ;;  %v8510_v1 = vadd.f32 %v6296_v56, %v6295_v47 }
 0x251   : > { %8773 = vst [vmem:[#allocation2_spill] sm:$0xff] %v8508_v63  ;;  %v8513_v51 = vadd.f32 %v8774_v18, %v6081_v23 }
 0x253   : > { %8775 = vst [vmem:[#allocation3_spill] sm:$0xff] %v8513_v51  ;;  %v6082_v25 = vpop.f32.mrb[168].mxu0  ;;  %v6298_v0 = vpop.f32.mrb[80].mxu1 }
 0x254   : > { %v6083_v3 = vpop.f32.mrb[169].mxu0  ;;  %v6299_v46 = vpop.f32.mrb[81].mxu1 }
 0x255   : > { %v6084_v28 = vadd.f32 %v6083_v3, %v6082_v25  ;;  %v8515_v50 = vadd.f32 %v6299_v46, %v6298_v0  ;;  %v6085_v34 = vpop.f32.mrb[170].mxu0  ;;  %v6301_v60 = vpop.f32.mrb[82].mxu1 }
 0x256   : > { %v6086_v44 = vpop.f32.mrb[171].mxu0  ;;  %v6302_v9 = vpop.f32.mrb[83].mxu1 }
 0x257   : > { %v8518_v39 = vadd.f32 %v8220_v24, %v6084_v28  ;;  %v6087_v16 = vadd.f32 %v6086_v44, %v6085_v34  ;;  %v8520_v47 = vadd.f32 %v6302_v9, %v6301_v60 }
 0x259   : > { %v8523_v62 = vadd.f32 %v8223_v48, %v6087_v16 }
 0x25b   : > { %8776 = vst [vmem:[#allocation4_spill] sm:$0xff] %v8523_v62  ;;  %v6124_v56 = vpop.f32.mrb[172].mxu0  ;;  %v6304_v42 = vpop.f32.mrb[84].mxu1 }
 0x25c   : > { %v6125_v23 = vpop.f32.mrb[173].mxu0  ;;  %v6305_v18 = vpop.f32.mrb[85].mxu1 }
 0x25d   : > { %v6126_v25 = vadd.f32 %v6125_v23, %v6124_v56  ;;  %v8525_v0 = vadd.f32 %v6305_v18, %v6304_v42  ;;  %v6127_v3 = vpop.f32.mrb[174].mxu0  ;;  %v6307_v46 = vpop.f32.mrb[86].mxu1 }
 0x25e   : > { %v6128_v51 = vpop.f32.mrb[175].mxu0  ;;  %v6308_v63 = vpop.f32.mrb[87].mxu1 }
 0x25f   : > { %v6597_v24 = vadd.f32 %v8373_v13, %v6126_v25  ;;  %v6129_v28 = vadd.f32 %v6128_v51, %v6127_v3  ;;  %v8528_v34 = vadd.f32 %v6308_v63, %v6307_v46 }
 0x261   : > { %v6609_v60 = vadd.f32 %v8378_v31, %v6129_v28  ;;  %v8532_v48 = vadd.f32 %v6597_v24, %v8445_v40 }
 0x263   : > { %v6130_v44 = vpop.f32.mrb[176].mxu0  ;;  %v6310_v9 = vpop.f32.mrb[88].mxu1  ;;  %v8535_v16 = vadd.f32 %v6609_v60, %v8450_v52 }
 0x264   : > { %v6131_v56 = vpop.f32.mrb[177].mxu0  ;;  %v6311_v42 = vpop.f32.mrb[89].mxu1 }
 0x265   : > { %v6132_v23 = vadd.f32 %v6131_v56, %v6130_v44  ;;  %v8537_v18 = vadd.f32 %v6311_v42, %v6310_v9  ;;  %v6133_v62 = vpop.f32.mrb[178].mxu0  ;;  %v6313_v13 = vpop.f32.mrb[90].mxu1 }
 0x266   : > { %v6134_v51 = vpop.f32.mrb[179].mxu0  ;;  %v6314_v63 = vpop.f32.mrb[91].mxu1 }
 0x267   : > { %v6591_v25 = vadd.f32 %v8385_v19, %v6132_v23  ;;  %v6135_v31 = vadd.f32 %v6134_v51, %v6133_v62  ;;  %v8540_v3 = vadd.f32 %v6314_v63, %v6313_v13 }
 0x269   : > { %v6603_v40 = vadd.f32 %v8390_v17, %v6135_v31  ;;  %v8544_v46 = vadd.f32 %v6591_v25, %v8455_v57 }
 0x26b   : > { %v6136_v52 = vpop.f32.mrb[180].mxu0  ;;  %v6316_v24 = vpop.f32.mrb[92].mxu1  ;;  %v8547_v28 = vadd.f32 %v6603_v40, %v8460_v54 }
 0x26c   : > { %v6137_v60 = vpop.f32.mrb[181].mxu0  ;;  %v6317_v44 = vpop.f32.mrb[93].mxu1 }
 0x26d   : > { %v6138_v9 = vadd.f32 %v6137_v60, %v6136_v52  ;;  %v8549_v56 = vadd.f32 %v6317_v44, %v6316_v24  ;;  %v6139_v42 = vpop.f32.mrb[182].mxu0  ;;  %v6319_v19 = vpop.f32.mrb[94].mxu1 }
 0x26e   : > { %v6140_v62 = vpop.f32.mrb[183].mxu0  ;;  %v6320_v23 = vpop.f32.mrb[95].mxu1 }
 0x26f   : > { %v6621_v13 = vadd.f32 %v8397_v35, %v6138_v9  ;;  %v6141_v17 = vadd.f32 %v6140_v62, %v6139_v42  ;;  %v8552_v51 = vadd.f32 %v6320_v23, %v6319_v19 }
 0x271   : > { %v6633_v57 = vadd.f32 %v8402_v58, %v6141_v17  ;;  %v8556_v63 = vadd.f32 %v6621_v13, %v8465_v61 }
 0x273   : > { %v6142_v54 = vpop.f32.mrb[184].mxu0  ;;  %v6322_v25 = vpop.f32.mrb[96].mxu1  ;;  %v8559_v31 = vadd.f32 %v6633_v57, %v8470_v29 }
 0x274   : > { %v6143_v40 = vpop.f32.mrb[185].mxu0  ;;  %v6323_v52 = vpop.f32.mrb[97].mxu1 }
 0x275   : > { %v6144_v24 = vadd.f32 %v6143_v40, %v6142_v54  ;;  %v8561_v60 = vadd.f32 %v6323_v52, %v6322_v25  ;;  %v6145_v44 = vpop.f32.mrb[186].mxu0  ;;  %v6325_v35 = vpop.f32.mrb[98].mxu1 }
 0x276   : > { %v6146_v9 = vpop.f32.mrb[187].mxu0  ;;  %v6326_v42 = vpop.f32.mrb[99].mxu1 }
 0x277   : > { %v6615_v19 = vadd.f32 %v8409_v4, %v6144_v24  ;;  %v6147_v58 = vadd.f32 %v6146_v9, %v6145_v44  ;;  %v8564_v62 = vadd.f32 %v6326_v42, %v6325_v35 }
 0x279   : > { %v6627_v61 = vadd.f32 %v8414_v26, %v6147_v58  ;;  %v8568_v23 = vadd.f32 %v6615_v19, %v8475_v49 }
 0x27b   : > { %v6148_v29 = vpop.f32.mrb[188].mxu0  ;;  %v6328_v13 = vpop.f32.mrb[100].mxu1  ;;  %v8571_v17 = vadd.f32 %v6627_v61, %v8480_v14 }
 0x27c   : > { %v6149_v57 = vpop.f32.mrb[189].mxu0  ;;  %v6329_v54 = vpop.f32.mrb[101].mxu1 }
 0x27d   : > { %v6150_v25 = vadd.f32 %v6149_v57, %v6148_v29  ;;  %v8573_v40 = vadd.f32 %v6329_v54, %v6328_v13  ;;  %v6151_v52 = vpop.f32.mrb[190].mxu0  ;;  %v6331_v4 = vpop.f32.mrb[102].mxu1 }
 0x27e   : > { %v6152_v24 = vpop.f32.mrb[191].mxu0  ;;  %v6332_v44 = vpop.f32.mrb[103].mxu1 }
 0x27f   : > { %v6645_v35 = vadd.f32 %v8420_v6, %v6150_v25  ;;  %v6153_v26 = vadd.f32 %v6152_v24, %v6151_v52  ;;  %v8576_v9 = vadd.f32 %v6332_v44, %v6331_v4 }
 0x281   : > { %v6657_v49 = vadd.f32 %v8425_v45, %v6153_v26  ;;  %v8580_v42 = vadd.f32 %v6645_v35, %v8485_v10 }
 0x283   : > { %v6154_v14 = vpop.f32.mrb[192].mxu0  ;;  %v6334_v19 = vpop.f32.mrb[104].mxu1  ;;  %v8583_v58 = vadd.f32 %v6657_v49, %v8490_v11 }
 0x284   : > { %v6155_v61 = vpop.f32.mrb[193].mxu0  ;;  %v6335_v29 = vpop.f32.mrb[105].mxu1 }
 0x285   : > { %v6156_v13 = vadd.f32 %v6155_v61, %v6154_v14  ;;  %v8585_v57 = vadd.f32 %v6335_v29, %v6334_v19  ;;  %v6157_v54 = vpop.f32.mrb[194].mxu0  ;;  %v6337_v6 = vpop.f32.mrb[106].mxu1 }
 0x286   : > { %v6158_v25 = vpop.f32.mrb[195].mxu0  ;;  %v6338_v52 = vpop.f32.mrb[107].mxu1 }
 0x287   : > { %v6639_v4 = vadd.f32 %v8428_v7, %v6156_v13  ;;  %v6159_v45 = vadd.f32 %v6158_v25, %v6157_v54  ;;  %v8588_v24 = vadd.f32 %v6338_v52, %v6337_v6 }
 0x289   : > { %v6651_v10 = vadd.f32 %v8431_v30, %v6159_v45  ;;  %v8592_v44 = vadd.f32 %v6639_v4, %v8495_v36 }
 0x28b   : > { %v6160_v11 = vpop.f32.mrb[196].mxu0  ;;  %v6340_v35 = vpop.f32.mrb[108].mxu1  ;;  %v8595_v26 = vadd.f32 %v6651_v10, %v8500_v8 }
 0x28c   : > { %v6161_v49 = vpop.f32.mrb[197].mxu0  ;;  %v6341_v14 = vpop.f32.mrb[109].mxu1 }
 0x28d   : > { %v6162_v19 = vadd.f32 %v6161_v49, %v6160_v11  ;;  %v8597_v61 = vadd.f32 %v6341_v14, %v6340_v35  ;;  %v6163_v29 = vpop.f32.mrb[198].mxu0  ;;  %v6343_v7 = vpop.f32.mrb[110].mxu1 }
 0x28e   : > { %v6164_v13 = vpop.f32.mrb[199].mxu0  ;;  %v6344_v54 = vpop.f32.mrb[111].mxu1 }
 0x28f   : > { %v6669_v6 = vadd.f32 %v8434_v41, %v6162_v19  ;;  %v6165_v30 = vadd.f32 %v6164_v13, %v6163_v29  ;;  %v8600_v25 = vadd.f32 %v6344_v54, %v6343_v7 }
 0x291   : > { %v6681_v36 = vadd.f32 %v8437_v15, %v6165_v30  ;;  %v8604_v52 = vadd.f32 %v6669_v6, %v8505_v55 }
 0x293   : > { %v6166_v8 = vpop.f32.mrb[200].mxu0  ;;  %v6346_v4 = vpop.f32.mrb[112].mxu1  ;;  %v8607_v45 = vadd.f32 %v6681_v36, %v8510_v1 }
 0x294   : > { %v6167_v10 = vpop.f32.mrb[201].mxu0  ;;  %v6347_v11 = vpop.f32.mrb[113].mxu1 }
 0x295   : > { %v6168_v35 = vadd.f32 %v6167_v10, %v6166_v8  ;;  %v8609_v49 = vadd.f32 %v6347_v11, %v6346_v4  ;;  %v6169_v14 = vpop.f32.mrb[202].mxu0  ;;  %v6349_v41 = vpop.f32.mrb[114].mxu1 }
 0x296   : > { %v6170_v19 = vpop.f32.mrb[203].mxu0  ;;  %v6350_v29 = vpop.f32.mrb[115].mxu1 }
 0x297   : > { %v6663_v7 = vadd.f32 %v8440_v20, %v6168_v35  ;;  %v6171_v15 = vadd.f32 %v6170_v19, %v6169_v14  ;;  %v8612_v13 = vadd.f32 %v6350_v29, %v6349_v41 }
 0x299   : > { %v6675_v55 = vadd.f32 %v8443_v22, %v6171_v15  ;;  %v6664_v54 = vadd.f32 %v6663_v7, %v8515_v50 }
 0x29b   : > { %v6172_v1 = vpop.f32.mrb[204].mxu0  ;;  %v6542_v6 = vpop.f32.mrb[0].mxu1  ;;  %v6676_v30 = vadd.f32 %v6675_v55, %v8520_v47 }
 0x29c   : > { %v8618_v36 = vadd.f32 %v8544_v46, %v6542_v6  ;;  %v6173_v8 = vpop.f32.mrb[205].mxu0  ;;  %v4398_v4 = vpop.f32.mrb[1].mxu1 }
 0x29d   : > { %v6174_v10 = vadd.f32 %v6173_v8, %v6172_v1  ;;  %v8621_v11 = vadd.f32 %v8532_v48, %v4398_v4  ;;  %v6175_v20 = vpop.f32.mrb[206].mxu0  ;;  %v6543_v35 = vpop.f32.mrb[2].mxu1 }
 0x29e   : > { %v8624_v14 = vadd.f32 %v8547_v28, %v6543_v35  ;;  %v6176_v22 = vpop.f32.mrb[207].mxu0  ;;  %v4401_v50 = vpop.f32.mrb[3].mxu1 }
 0x29f   : > { %v6693_v41 = vadd.f32 %v8448_v43, %v6174_v10  ;;  %v6177_v19 = vadd.f32 %v6176_v22, %v6175_v20  ;;  %v8628_v47 = vadd.f32 %v8535_v16, %v4401_v50 }
 0x2a1   : > { %v6705_v46 = vadd.f32 %v8453_v21, %v6177_v19  ;;  %v6694_v29 = vadd.f32 %v6693_v41, %v8525_v0 }
 0x2a3   : > { %v6178_v7 = vpop.f32.mrb[208].mxu0  ;;  %v6546_v48 = vpop.f32.mrb[4].mxu1  ;;  %v8633_v15 = vadd.f32 %v6705_v46, %v8528_v34 }
 0x2a4   : > { %v8636_v28 = vadd.f32 %v8568_v23, %v6546_v48  ;;  %v6179_v55 = vpop.f32.mrb[209].mxu0  ;;  %v4414_v1 = vpop.f32.mrb[5].mxu1 }
 0x2a5   : > { %v6180_v6 = vadd.f32 %v6179_v55, %v6178_v7  ;;  %v8639_v43 = vadd.f32 %v8556_v63, %v4414_v1  ;;  %v6181_v16 = vpop.f32.mrb[210].mxu0  ;;  %v6547_v8 = vpop.f32.mrb[6].mxu1 }
 0x2a6   : > { %v8642_v21 = vadd.f32 %v8571_v17, %v6547_v8  ;;  %v6182_v0 = vpop.f32.mrb[211].mxu0  ;;  %v4417_v4 = vpop.f32.mrb[7].mxu1 }
 0x2a7   : > { %v6687_v10 = vadd.f32 %v8458_v59, %v6180_v6  ;;  %v6183_v34 = vadd.f32 %v6182_v0, %v6181_v16  ;;  %v8646_v20 = vadd.f32 %v8559_v31, %v4417_v4 }
 0x2a9   : > { %v6699_v23 = vadd.f32 %v8463_v38, %v6183_v34  ;;  %v6688_v35 = vadd.f32 %v6687_v10, %v8537_v18 }
 0x2ab   : > { %v6184_v22 = vpop.f32.mrb[212].mxu0  ;;  %v6550_v63 = vpop.f32.mrb[8].mxu1  ;;  %v6700_v50 = vadd.f32 %v6699_v23, %v8540_v3 }
 0x2ac   : > { %v8652_v41 = vadd.f32 %v8592_v44, %v6550_v63  ;;  %v6185_v17 = vpop.f32.mrb[213].mxu0  ;;  %v4430_v19 = vpop.f32.mrb[9].mxu1 }
 0x2ad   : > { %v6186_v46 = vadd.f32 %v6185_v17, %v6184_v22  ;;  %v8655_v59 = vadd.f32 %v8580_v42, %v4430_v19  ;;  %v6187_v7 = vpop.f32.mrb[214].mxu0  ;;  %v6551_v31 = vpop.f32.mrb[10].mxu1 }
 0x2ae   : > { %v8658_v48 = vadd.f32 %v8595_v26, %v6551_v31  ;;  %v6188_v38 = vpop.f32.mrb[215].mxu0  ;;  %v4433_v18 = vpop.f32.mrb[11].mxu1 }
 0x2af   : > { %v6717_v55 = vadd.f32 %v8468_v5, %v6186_v46  ;;  %v6189_v1 = vadd.f32 %v6188_v38, %v6187_v7  ;;  %v8662_v3 = vadd.f32 %v8583_v58, %v4433_v18 }
 0x2b1   : > { %v6729_v44 = vadd.f32 %v8473_v37, %v6189_v1  ;;  %v6718_v6 = vadd.f32 %v6717_v55, %v8549_v56 }
 0x2b3   : > { %v6190_v16 = vpop.f32.mrb[216].mxu0  ;;  %v6554_v42 = vpop.f32.mrb[12].mxu1  ;;  %v6730_v8 = vadd.f32 %v6729_v44, %v8552_v51 }
 0x2b4   : > { %v8667_v0 = vadd.f32 %v6664_v54, %v6554_v42  ;;  %v6191_v26 = vpop.f32.mrb[217].mxu0  ;;  %v4446_v4 = vpop.f32.mrb[13].mxu1 }
 0x2b5   : > { %v6192_v10 = vadd.f32 %v6191_v26, %v6190_v16  ;;  %v8670_v34 = vadd.f32 %v8604_v52, %v4446_v4  ;;  %v6193_v5 = vpop.f32.mrb[218].mxu0  ;;  %v6555_v23 = vpop.f32.mrb[14].mxu1 }
 0x2b6   : > { %v8672_v58 = vadd.f32 %v6676_v30, %v6555_v23  ;;  %v6194_v22 = vpop.f32.mrb[219].mxu0  ;;  %v4449_v37 = vpop.f32.mrb[15].mxu1 }
 0x2b7   : > { %v6711_v56 = vadd.f32 %v8478_v32, %v6192_v10  ;;  %v6195_v63 = vadd.f32 %v6194_v22, %v6193_v5  ;;  %v8676_v17 = vadd.f32 %v8607_v45, %v4449_v37 }
 0x2b9   : > { %v6723_v51 = vadd.f32 %v8483_v33, %v6195_v63  ;;  %v6712_v54 = vadd.f32 %v6711_v56, %v8561_v60 }
 0x2bb   : > { %v6196_v19 = vpop.f32.mrb[220].mxu0  ;;  %v6558_v46 = vpop.f32.mrb[16].mxu1  ;;  %v6724_v52 = vadd.f32 %v6723_v51, %v8564_v62 }
 0x2bc   : > { %v6689_v7 = vadd.f32 %v6688_v35, %v6558_v46  ;;  %v6197_v31 = vpop.f32.mrb[221].mxu0  ;;  %v4462_v30 = vpop.f32.mrb[17].mxu1 }
 0x2bd   : > { %v6198_v38 = vadd.f32 %v6197_v31, %v6196_v19  ;;  %v6695_v18 = vadd.f32 %v6694_v29, %v4462_v30  ;;  %v6199_v55 = vpop.f32.mrb[222].mxu0  ;;  %v6559_v1 = vpop.f32.mrb[18].mxu1 }
 0x2be   : > { %v6701_v32 = vadd.f32 %v6700_v50, %v6559_v1  ;;  %v6200_v44 = vpop.f32.mrb[223].mxu0  ;;  %v4465_v16 = vpop.f32.mrb[19].mxu1  ;;  %v6937_v45 = vpack.i.bf16 %v6689_v7, %v8618_v36 }
 0x2bf   : > { %v6741_v33 = vadd.f32 %v8488_v2, %v6198_v38  ;;  %v6201_v42 = vadd.f32 %v6200_v44, %v6199_v55  ;;  %v6707_v60 = vadd.f32 %v8633_v15, %v4465_v16  ;;  %v6933_v26 = vpack.i.bf16 %v6695_v18, %v8621_v11 }
 0x2c0   : > { %v6939_v62 = vpack.i.bf16 %v6701_v32, %v8624_v14 }
 0x2c1   : > { %v6753_v35 = vadd.f32 %v8493_v12, %v6201_v42  ;;  %6934 = vxpose.xlu0.b32.start [1/16] %v6933_v26, 128  ;;  %v6935_v29 = vpack.i.bf16 %v6707_v60, %v8628_v47  ;;  %v6742_v50 = vadd.f32 %v6741_v33, %v8573_v40 }
 0x2c3   : > { %v6202_v4 = vpop.f32.mrb[224].mxu0  ;;  %v6562_v10 = vpop.f32.mrb[20].mxu1  ;;  %v6754_v36 = vadd.f32 %v6753_v35, %v8576_v9 }
 0x2c4   : > { %v8690_v5 = vadd.f32 %v6712_v54, %v6562_v10  ;;  %v6203_v2 = vpop.f32.mrb[225].mxu0  ;;  %v4478_v23 = vpop.f32.mrb[21].mxu1 }
 0x2c5   : > { %v6204_v15 = vadd.f32 %v6203_v2, %v6202_v4  ;;  %v6719_v22 = vadd.f32 %v6718_v6, %v4478_v23  ;;  %v6205_v11 = vpop.f32.mrb[226].mxu0  ;;  %v6563_v37 = vpop.f32.mrb[22].mxu1  ;;  %6936 = vxpose.xlu0.b32.cont [2/16] %v6935_v29, 128 }
 0x2c6   : > { %v6725_v14 = vadd.f32 %v6724_v52, %v6563_v37  ;;  %v6206_v12 = vpop.f32.mrb[227].mxu0  ;;  %v4481_v56 = vpop.f32.mrb[23].mxu1  ;;  %v6945_v47 = vpack.i.bf16 %v8690_v5, %v8636_v28 }
 0x2c7   : > { %v6735_v40 = vadd.f32 %v8498_v27, %v6204_v15  ;;  %v6207_v63 = vadd.f32 %v6206_v12, %v6205_v11  ;;  %v6731_v51 = vadd.f32 %v6730_v8, %v4481_v56  ;;  %v6941_v9 = vpack.i.bf16 %v6719_v22, %v8639_v43  ;;  %v8779_v15 = vld [vmem:[#allocation4_spill] sm:$0xff] }
 0x2c8   : > { %v6947_v54 = vpack.i.bf16 %v6725_v14, %v8642_v21 }
 0x2c9   : > { %v6747_v19 = vadd.f32 %v8503_v53, %v6207_v63  ;;  %6938 = vxpose.xlu0.b32.cont [3/16] %v6937_v45, 128  ;;  %v6736_v6 = vadd.f32 %v6735_v40, %v8585_v57  ;;  %v6943_v46 = vpack.i.bf16 %v6731_v51, %v8646_v20  ;;  %v8777_v57 = vld [vmem:[#allocation2_spill] sm:$0xff]  ;;  %v8778_v45 = vld [vmem:[#allocation3_spill] sm:$0xff] }
 0x2cb   : > { %v6208_v52 = vpop.f32.mrb[228].mxu0  ;;  %v6566_v7 = vpop.f32.mrb[24].mxu1  ;;  %v6748_v31 = vadd.f32 %v6747_v19, %v8588_v24 }
 0x2cc   : > { %v6737_v28 = vadd.f32 %v6736_v6, %v6566_v7  ;;  %v6209_v30 = vpop.f32.mrb[229].mxu0  ;;  %v4494_v27 = vpop.f32.mrb[25].mxu1 }
 0x2cd   : > { %v6210_v38 = vadd.f32 %v6209_v30, %v6208_v52  ;;  %v6743_v8 = vadd.f32 %v6742_v50, %v4494_v27  ;;  %v6211_v18 = vpop.f32.mrb[230].mxu0  ;;  %v6567_v43 = vpop.f32.mrb[26].mxu1  ;;  %6940 = vxpose.xlu0.b32.cont [4/16] %v6939_v62, 128 }
 0x2ce   : > { %v6749_v21 = vadd.f32 %v6748_v31, %v6567_v43  ;;  %v6212_v55 = vpop.f32.mrb[231].mxu0  ;;  %v4497_v53 = vpop.f32.mrb[27].mxu1  ;;  %v6953_v1 = vpack.i.bf16 %v6737_v28, %v8652_v41 }
 0x2cf   : > { %v6765_v32 = vadd.f32 %v8777_v57, %v6210_v38  ;;  %v6213_v20 = vadd.f32 %v6212_v55, %v6211_v18  ;;  %v6755_v44 = vadd.f32 %v6754_v36, %v4497_v53  ;;  %v6949_v16 = vpack.i.bf16 %v6743_v8, %v8655_v59 }
 0x2d0   : > { %v6955_v24 = vpack.i.bf16 %v6749_v21, %v8658_v48 }
 0x2d1   : > { %v6777_v33 = vadd.f32 %v8778_v45, %v6213_v20  ;;  %6942 = vxpose.xlu0.b32.cont [5/16] %v6941_v9, 128  ;;  %v6766_v42 = vadd.f32 %v6765_v32, %v8597_v61  ;;  %v6951_v60 = vpack.i.bf16 %v6755_v44, %v8662_v3 }
 0x2d3   : > { %v6214_v26 = vpop.f32.mrb[232].mxu0  ;;  %v6570_v62 = vpop.f32.mrb[28].mxu1  ;;  %v6778_v35 = vadd.f32 %v6777_v33, %v8600_v25 }
 0x2d4   : > { %v6215_v41 = vpop.f32.mrb[233].mxu0  ;;  %v4510_v29 = vpop.f32.mrb[29].mxu1 }
 0x2d5   : > { %v6216_v50 = vadd.f32 %v6215_v41, %v6214_v26  ;;  %v6767_v4 = vadd.f32 %v6766_v42, %v4510_v29  ;;  %v6217_v10 = vpop.f32.mrb[234].mxu0  ;;  %v6571_v36 = vpop.f32.mrb[30].mxu1  ;;  %6944 = vxpose.xlu0.b32.cont [6/16] %v6943_v46, 128 }
 0x2d6   : > { %v6218_v59 = vpop.f32.mrb[235].mxu0  ;;  %v4513_v48 = vpop.f32.mrb[31].mxu1 }
 0x2d7   : > { %v6759_v5 = vadd.f32 %v8518_v39, %v6216_v50  ;;  %v6219_v2 = vadd.f32 %v6218_v59, %v6217_v10  ;;  %v6779_v23 = vadd.f32 %v6778_v35, %v4513_v48  ;;  %v6957_v61 = vpack.i.bf16 %v6767_v4, %v8670_v34 }
 0x2d9   : > { %v6760_v3 = vadd.f32 %v6759_v5, %v8609_v49  ;;  %v6771_v22 = vadd.f32 %v8779_v15, %v6219_v2  ;;  %6946 = vxpose.xlu0.b32.cont [7/16] %v6945_v47, 128  ;;  %v6959_v25 = vpack.i.bf16 %v6779_v23, %v8676_v17 }
 0x2db   : > { %v6772_v11 = vadd.f32 %v6771_v22, %v8612_v13  ;;  %v6761_v37 = vadd.f32 %v6760_v3, %v6570_v62 }
 0x2dd   : > { %6948 = vxpose.xlu0.b32.cont [8/16] %v6947_v54, 128  ;;  %v6961_v14 = vpack.i.bf16 %v6761_v37, %v8667_v0  ;;  %v6773_v12 = vadd.f32 %v6772_v11, %v6571_v36 }
 0x2df   : > { %v6963_v39 = vpack.i.bf16 %v6773_v12, %v8672_v58 }
 0x2e1   : > { %6950 = vxpose.xlu0.b32.cont [9/16] %v6949_v16, 128 }
 0x2e5   : > { %6952 = vxpose.xlu0.b32.cont [10/16] %v6951_v60, 128 }
 0x2e9   : > { %6954 = vxpose.xlu0.b32.cont [11/16] %v6953_v1, 128 }
 0x2ed   : > { %6956 = vxpose.xlu0.b32.cont [12/16] %v6955_v24, 128 }
 0x2f1   : > { %6958 = vxpose.xlu0.b32.cont [13/16] %v6957_v61, 128 }
 0x2f5   : > { %6960 = vxpose.xlu0.b32.cont [14/16] %v6959_v25, 128 }
 0x2f9   : > { %6962 = vxpose.xlu0.b32.cont [15/16] %v6961_v14, 128 }
 0x2fd   : > { %6964 = vxpose.xlu0.b32.end [16/16] %v6963_v39, 128 }
 0x341   : > { %v6965_v49 = vpop.trf.xlu0 }
 0x342   : > { %v6969_v34 = vunpack.i.h.bf16 %v6965_v49  ;;  %v6966_v17 = vunpack.i.l.bf16 %v6965_v49 }
 0x344   : > { %v5696_v13 = vpack.c.bf16 %v6969_v34, %v6966_v17 }
 0x345   : > { %v6970_v0 = vpop.trf.xlu0 }
 0x346   : > { %4717 = vst [vmem:[%s8721_s25] sm:$0xff] %v5696_v13  ;;  %v6974_v58 = vunpack.i.h.bf16 %v6970_v0  ;;  %v6971_v56 = vunpack.i.l.bf16 %v6970_v0 }
 0x348   : > { %v5697_v47 = vpack.c.bf16 %v6974_v58, %v6971_v56 }
 0x349   : > { %v6975_v40 = vpop.trf.xlu0 }
 0x34a   : > { %4718 = vst [vmem:[%s8721_s25 + $0x8] sm:$0xff] %v5697_v47  ;;  %v6979_v63 = vunpack.i.h.bf16 %v6975_v40  ;;  %v6976_v51 = vunpack.i.l.bf16 %v6975_v40 }
 0x34c   : > { %v5698_v9 = vpack.c.bf16 %v6979_v63, %v6976_v51 }
 0x34d   : > { %v6980_v54 = vpop.trf.xlu0 }
 0x34e   : > { %4719 = vst [vmem:[%s8721_s25 + $0x10] sm:$0xff] %v5698_v9  ;;  %v6984_v19 = vunpack.i.h.bf16 %v6980_v54  ;;  %v6981_v6 = vunpack.i.l.bf16 %v6980_v54 }
 0x350   : > { %v5699_v46 = vpack.c.bf16 %v6984_v19, %v6981_v6 }
 0x351   : > { %v6985_v52 = vpop.trf.xlu0 }
 0x352   : > { %4720 = vst [vmem:[%s8721_s25 + $0x18] sm:$0xff] %v5699_v46  ;;  %v6989_v7 = vunpack.i.h.bf16 %v6985_v52  ;;  %v6986_v31 = vunpack.i.l.bf16 %v6985_v52 }
 0x354   : > { %v5700_v28 = vpack.c.bf16 %v6989_v7, %v6986_v31 }
 0x355   : > { %v6990_v30 = vpop.trf.xlu0 }
 0x356   : > { %4721 = vst [vmem:[%s8721_s25 + $0x20] sm:$0xff] %v5700_v28  ;;  %v6994_v27 = vunpack.i.h.bf16 %v6990_v30  ;;  %v6991_v38 = vunpack.i.l.bf16 %v6990_v30 }
 0x358   : > { %v5701_v8 = vpack.c.bf16 %v6994_v27, %v6991_v38 }
 0x359   : > { %v6995_v18 = vpop.trf.xlu0 }
 0x35a   : > { %4722 = vst [vmem:[%s8721_s25 + $0x28] sm:$0xff] %v5701_v8  ;;  %v6999_v43 = vunpack.i.h.bf16 %v6995_v18  ;;  %v6996_v21 = vunpack.i.l.bf16 %v6995_v18 }
 0x35c   : > { %v5702_v55 = vpack.c.bf16 %v6999_v43, %v6996_v21 }
 0x35d   : > { %v7000_v53 = vpop.trf.xlu0 }
 0x35e   : > { %4723 = vst [vmem:[%s8721_s25 + $0x30] sm:$0xff] %v5702_v55  ;;  %v7004_v1 = vunpack.i.h.bf16 %v7000_v53  ;;  %v7001_v57 = vunpack.i.l.bf16 %v7000_v53 }
 0x360   : > { %v5703_v32 = vpack.c.bf16 %v7004_v1, %v7001_v57 }
 0x361   : > { %v7005_v20 = vpop.trf.xlu0 }
 0x362   : > { %4724 = vst [vmem:[%s8721_s25 + $0x38] sm:$0xff] %v5703_v32  ;;  %v7009_v44 = vunpack.i.h.bf16 %v7005_v20  ;;  %v7006_v16 = vunpack.i.l.bf16 %v7005_v20 }
 0x364   : > { %v5704_v24 = vpack.c.bf16 %v7009_v44, %v7006_v16 }
 0x365   : > { %v7010_v45 = vpop.trf.xlu0 }
 0x366   : > { %4725 = vst [vmem:[%s8721_s25 + $0x40] sm:$0xff] %v5704_v24  ;;  %v7014_v33 = vunpack.i.h.bf16 %v7010_v45  ;;  %v7011_v42 = vunpack.i.l.bf16 %v7010_v45 }
 0x368   : > { %v5705_v60 = vpack.c.bf16 %v7014_v33, %v7011_v42 }
 0x369   : > { %v7015_v26 = vpop.trf.xlu0 }
 0x36a   : > { %4726 = vst [vmem:[%s8721_s25 + $0x48] sm:$0xff] %v5705_v60  ;;  %v7019_v62 = vunpack.i.h.bf16 %v7015_v26  ;;  %v7016_v35 = vunpack.i.l.bf16 %v7015_v26 }
 0x36c   : > { %v5706_v41 = vpack.c.bf16 %v7019_v62, %v7016_v35 }
 0x36d   : > { %v7020_v29 = vpop.trf.xlu0 }
 0x36e   : > { %4727 = vst [vmem:[%s8721_s25 + $0x50] sm:$0xff] %v5706_v41  ;;  %v7024_v50 = vunpack.i.h.bf16 %v7020_v29  ;;  %v7021_v4 = vunpack.i.l.bf16 %v7020_v29 }
 0x370   : > { %v5707_v10 = vpack.c.bf16 %v7024_v50, %v7021_v4 }
 0x371   : > { %v7025_v36 = vpop.trf.xlu0 }
 0x372   : > { %4728 = vst [vmem:[%s8721_s25 + $0x58] sm:$0xff] %v5707_v10  ;;  %v7029_v59 = vunpack.i.h.bf16 %v7025_v36  ;;  %v7026_v48 = vunpack.i.l.bf16 %v7025_v36 }
 0x374   : > { %v5708_v5 = vpack.c.bf16 %v7029_v59, %v7026_v48 }
 0x375   : > { %v7030_v2 = vpop.trf.xlu0 }
 0x376   : > { %4729 = vst [vmem:[%s8721_s25 + $0x60] sm:$0xff] %v5708_v5  ;;  %v7034_v23 = vunpack.i.h.bf16 %v7030_v2  ;;  %v7031_v61 = vunpack.i.l.bf16 %v7030_v2 }
 0x378   : > { %v5709_v3 = vpack.c.bf16 %v7034_v23, %v7031_v61 }
 0x379   : > { %v7035_v15 = vpop.trf.xlu0 }
 0x37a   : > { %4730 = vst [vmem:[%s8721_s25 + $0x68] sm:$0xff] %v5709_v3  ;;  %v7039_v22 = vunpack.i.h.bf16 %v7035_v15  ;;  %v7036_v25 = vunpack.i.l.bf16 %v7035_v15 }
 0x37c   : > { %v5710_v11 = vpack.c.bf16 %v7039_v22, %v7036_v25 }
 0x37d   : > { %v7040_v37 = vpop.trf.xlu0 }
 0x37e   : > { %4731 = vst [vmem:[%s8721_s25 + $0x70] sm:$0xff] %v5710_v11  ;;  %v7044_v14 = vunpack.i.h.bf16 %v7040_v37  ;;  %v7041_v12 = vunpack.i.l.bf16 %v7040_v37 }
 0x380   : > { %v5711_v39 = vpack.c.bf16 %v7044_v14, %v7041_v12 }
 0x382   : > { %4732 = vst [vmem:[%s8721_s25 + $0x78] sm:$0xff] %v5711_v39 }
 0x383 PF: > { %s13_s14 = sadd.s32 1, %s7355_s14   ;;  %s8780_s12 = smov %s7351_s13 }
 0x384   : > { %p10_p5 = scmp.ge.s32.totalorder %s13_s14, 4   ;;  %s8781_s13 = smov %s8783_s15 }
 0x386   :  { %12 = sbr.rel (!%p10_p5) target bundleno = 2 (0x2), region = 71 }

</bundles_post_ra>
